<compile_context>
chip_gen: v7x
topology: tpu7x:2x2x1
jax: 0.10.0
libtpu: 0.0.40
codegen_flags: <defaults>
</compile_context>

<pallas_src>
import jax
import jax.numpy as jnp
from jax.experimental import pallas as pl
from jax.experimental.pallas import tpu as pltpu

LANE = 128


def _round_up(x, m):
    return (x + m - 1) // m * m


def _mlp_kernel(x_ref,
                w1_ref, b1_ref,
                w2_ref, b2_ref,
                w3_ref, b3_ref,
                w4_ref, b4_ref,
                o_ref):
    # In-kernel f32 -> bf16 cast (VPU work hidden under MXU/DMA).
    x = x_ref[...].astype(jnp.bfloat16)
    # fc1 + relu  (bf16 operands, f32 accumulation, bias add in f32)
    h = jnp.dot(x, w1_ref[...], preferred_element_type=jnp.float32)
    h = jnp.maximum(h + b1_ref[...], 0.0).astype(jnp.bfloat16)
    # fc2 + relu
    h = jnp.dot(h, w2_ref[...], preferred_element_type=jnp.float32)
    h = jnp.maximum(h + b2_ref[...], 0.0).astype(jnp.bfloat16)
    # fc3 + relu   (forward applies relu again before fc4; relu is idempotent)
    h = jnp.dot(h, w3_ref[...], preferred_element_type=jnp.float32)
    h = jnp.maximum(h + b3_ref[...], 0.0).astype(jnp.bfloat16)
    # fc4 (no activation), lane-dense padded output
    o = jnp.dot(h, w4_ref[...], preferred_element_type=jnp.float32)
    o_ref[...] = (o + b4_ref[...]).astype(o_ref.dtype)


@jax.jit
def simple_model_forward(x_nchw, params):
    """params: dict with w1..w4 of shape (in, out) and b1..b4 of shape (1, out)."""
    n = x_nchw.shape[0]
    feat = x_nchw.shape[1] * x_nchw.shape[-2] * x_nchw.shape[-1]
    x2d = x_nchw.reshape(n, feat)                      # f32; cast to bf16 in-kernel

    # Batch tile: up to 512 rows, multiple of 16 (bf16 sublane packing).
    tm = min(512, _round_up(n, 16))
    # v7x: for medium/large batches keep >= 2 grid steps so the "parallel"
    # batch axis actually shards across both TensorCores.
    if n > 256:
        while tm > 16 and pl.cdiv(n, tm) < 2:
            tm = _round_up(tm // 2, 16)
    grid = (pl.cdiv(n, tm),)                           # ragged last block is masked

    # Weights -> bf16; biases stay f32.
    w1 = params["w1"].astype(jnp.bfloat16)
    w2 = params["w2"].astype(jnp.bfloat16)
    w3 = params["w3"].astype(jnp.bfloat16)
    b1, b2, b3 = params["b1"], params["b2"], params["b3"]

    # Pad the final output width to a lane-dense multiple of 128.
    out_size = params["w4"].shape[1]
    out_pad = _round_up(out_size, LANE)
    w4 = params["w4"]
    b4 = params["b4"]
    if out_pad != out_size:
        w4 = jnp.pad(w4, ((0, 0), (0, out_pad - out_size)))
        b4 = jnp.pad(b4, ((0, 0), (0, out_pad - out_size)))
    w4 = w4.astype(jnp.bfloat16)

    def tiled(shape):            # moves with the batch grid index
        return pl.BlockSpec(shape, lambda i: (i, 0))

    def resident(shape):         # constant block: DMA'd once, stays in VMEM
        return pl.BlockSpec(shape, lambda i: (0, 0))

    out = pl.pallas_call(
        _mlp_kernel,
        out_shape=jax.ShapeDtypeStruct((n, out_pad), jnp.float32),
        grid=grid,
        in_specs=[
            tiled((tm, feat)),
            resident(w1.shape), resident(b1.shape),
            resident(w2.shape), resident(b2.shape),
            resident(w3.shape), resident(b3.shape),
            resident(w4.shape), resident(b4.shape),
        ],
        out_specs=tiled((tm, out_pad)),
        compiler_params=pltpu.CompilerParams(
            dimension_semantics=("parallel",)),
    )(x2d, w1, b1, w2, b2, w3, b3, w4, b4)

    return out[:, :out_size]


def init_params(key, input_size, output_size, gain=1.0):
    """Deterministic init mirroring SimpleModel.__init__ semantics:
    weights ~ U(-gain*sqrt(6/fan_in), +gain*sqrt(6/fan_in));
    biases ~ U(-1/sqrt(fan_in), +1/sqrt(fan_in)) (torch Linear default).
    Weights stored pre-transposed as (in, out), kept in f32 here."""
    dims = [input_size, 512, 256, 128, output_size]
    params = {}
    for i in range(4):
        fan_in, fan_out = dims[i], dims[i + 1]
        key, kw, kb = jax.random.split(key, 3)
        wb = gain * (6.0 / fan_in) ** 0.5
        bb = 1.0 / (fan_in ** 0.5)
        params[f"w{i+1}"] = jax.random.uniform(
            kw, (fan_in, fan_out), jnp.float32, minval=-wb, maxval=wb)
        params[f"b{i+1}"] = jax.random.uniform(
            kb, (1, fan_out), jnp.float32, minval=-bb, maxval=bb)
    return params


def _reference_bf16(x_nchw, params):
    """Same math as the kernel (bf16 operands, f32 accumulation)."""
    n = x_nchw.shape[0]
    x = x_nchw.reshape(n, -1).astype(jnp.bfloat16)
    h = x
    for i in range(1, 4):
        w = params[f"w{i}"].astype(jnp.bfloat16)
        h = jnp.dot(h, w, preferred_element_type=jnp.float32) + params[f"b{i}"]
        h = jnp.maximum(h, 0.0).astype(jnp.bfloat16)
    w4 = params["w4"].astype(jnp.bfloat16)
    return jnp.dot(h, w4, preferred_element_type=jnp.float32) + params["b4"]


def _reference_f32(x_nchw, params):
    n = x_nchw.shape[0]
    x = x_nchw.reshape(n, -1)
    h = jnp.maximum(x @ params["w1"] + params["b1"], 0.0)
    h = jnp.maximum(h @ params["w2"] + params["b2"], 0.0)
    h = jnp.maximum(h @ params["w3"] + params["b3"], 0.0)
    return h @ params["w4"] + params["b4"]


if __name__ == "__main__":
    key = jax.random.PRNGKey(0)
    batch, C, H, W = 2, 4, 16, 16
    input_size = C * H * W        # 1024
    output_size = 10

    key, kx, kp = jax.random.split(key, 3)
    x = jax.random.normal(kx, (batch, C, H, W), jnp.float32)
    params = init_params(kp, input_size, output_size, gain=1.0)

    out = simple_model_forward(x, params)
    out = jax.block_until_ready(out)
    assert out.shape == (batch, output_size)

    # Exact-algorithm reference (bf16 operands, f32 accumulation).
    ref_bf16 = _reference_bf16(x, params)
    assert jnp.allclose(out, ref_bf16, atol=2e-2, rtol=2e-2), \
        "mismatch vs bf16 reference"

    # Sanity vs full-f32 math (looser: bf16 weight/activation rounding).
    ref_f32 = _reference_f32(x, params)
    assert jnp.allclose(out, ref_f32, atol=1.5e-1, rtol=5e-2), \
        "mismatch vs f32 reference"

    print("KERNEL_OK")
</pallas_src>

<mosaic_0001>
module attributes {stable_mosaic.version = 11 : i64} {
  func.func @_mlp_kernel(%arg0: i32, %arg1: memref<16x1024xf32, #tpu.memory_space<vmem>>, %arg2: memref<1024x512xbf16, #tpu.memory_space<vmem>>, %arg3: memref<1x512xf32, #tpu.memory_space<vmem>>, %arg4: memref<512x256xbf16, #tpu.memory_space<vmem>>, %arg5: memref<1x256xf32, #tpu.memory_space<vmem>>, %arg6: memref<256x128xbf16, #tpu.memory_space<vmem>>, %arg7: memref<1x128xf32, #tpu.memory_space<vmem>>, %arg8: memref<128x128xbf16, #tpu.memory_space<vmem>>, %arg9: memref<1x128xf32, #tpu.memory_space<vmem>>, %arg10: memref<16x128xf32, #tpu.memory_space<vmem>>) attributes {dimension_semantics = [#tpu.dimension_semantics<parallel>], iteration_bounds = array<i64: 1>, scalar_prefetch = 0 : i64, scratch_operands = 0 : i64, tpu.core_type = #tpu.core_type<tc>, window_params = [{transform_indices = @transform_0, window_bounds = array<i64: 16, 1024>}, {pipeline_mode = #tpu.pipeline_mode<synchronous>, transform_indices = @transform_1, window_bounds = array<i64: 1024, 512>}, {pipeline_mode = #tpu.pipeline_mode<synchronous>, transform_indices = @transform_2, window_bounds = array<i64: 1, 512>}, {pipeline_mode = #tpu.pipeline_mode<synchronous>, transform_indices = @transform_3, window_bounds = array<i64: 512, 256>}, {pipeline_mode = #tpu.pipeline_mode<synchronous>, transform_indices = @transform_4, window_bounds = array<i64: 1, 256>}, {pipeline_mode = #tpu.pipeline_mode<synchronous>, transform_indices = @transform_5, window_bounds = array<i64: 256, 128>}, {pipeline_mode = #tpu.pipeline_mode<synchronous>, transform_indices = @transform_6, window_bounds = array<i64: 1, 128>}, {pipeline_mode = #tpu.pipeline_mode<synchronous>, transform_indices = @transform_7, window_bounds = array<i64: 128, 128>}, {pipeline_mode = #tpu.pipeline_mode<synchronous>, transform_indices = @transform_8, window_bounds = array<i64: 1, 128>}, {transform_indices = @transform_9, window_bounds = array<i64: 16, 128>}]} {
    %c0 = arith.constant 0 : index
    %c0_0 = arith.constant 0 : index
    %0 = vector.load %arg1[%c0, %c0_0] : memref<16x1024xf32, #tpu.memory_space<vmem>>, vector<16x1024xf32>
    %1 = arith.truncf %0 : vector<16x1024xf32> to vector<16x1024xbf16>
    %c0_1 = arith.constant 0 : index
    %c0_2 = arith.constant 0 : index
    %2 = vector.load %arg2[%c0_1, %c0_2] : memref<1024x512xbf16, #tpu.memory_space<vmem>>, vector<1024x512xbf16>
    %cst = arith.constant dense<0.000000e+00> : vector<16x512xf32>
    %3 = tpu.matmul %1, %2, %cst {dimension_numbers = #tpu.dot_dimension_numbers<[1], [0], [0], [1], [0, 0, 1, 1], [], []>} : vector<16x1024xbf16>, vector<1024x512xbf16>, vector<16x512xf32> -> vector<16x512xf32>
    %c0_3 = arith.constant 0 : index
    %c0_4 = arith.constant 0 : index
    %4 = vector.load %arg3[%c0_3, %c0_4] : memref<1x512xf32, #tpu.memory_space<vmem>>, vector<1x512xf32>
    %5 = vector.broadcast %4 : vector<1x512xf32> to vector<16x512xf32>
    %6 = arith.addf %3, %5 : vector<16x512xf32>
    %cst_5 = arith.constant 0.000000e+00 : f32
    %7 = vector.broadcast %cst_5 : f32 to vector<16x512xf32>
    %8 = arith.maximumf %6, %7 : vector<16x512xf32>
    %9 = arith.truncf %8 : vector<16x512xf32> to vector<16x512xbf16>
    %c0_6 = arith.constant 0 : index
    %c0_7 = arith.constant 0 : index
    %10 = vector.load %arg4[%c0_6, %c0_7] : memref<512x256xbf16, #tpu.memory_space<vmem>>, vector<512x256xbf16>
    %cst_8 = arith.constant dense<0.000000e+00> : vector<16x256xf32>
    %11 = tpu.matmul %9, %10, %cst_8 {dimension_numbers = #tpu.dot_dimension_numbers<[1], [0], [0], [1], [0, 0, 1, 1], [], []>} : vector<16x512xbf16>, vector<512x256xbf16>, vector<16x256xf32> -> vector<16x256xf32>
    %c0_9 = arith.constant 0 : index
    %c0_10 = arith.constant 0 : index
    %12 = vector.load %arg5[%c0_9, %c0_10] : memref<1x256xf32, #tpu.memory_space<vmem>>, vector<1x256xf32>
    %13 = vector.broadcast %12 : vector<1x256xf32> to vector<16x256xf32>
    %14 = arith.addf %11, %13 : vector<16x256xf32>
    %cst_11 = arith.constant 0.000000e+00 : f32
    %15 = vector.broadcast %cst_11 : f32 to vector<16x256xf32>
    %16 = arith.maximumf %14, %15 : vector<16x256xf32>
    %17 = arith.truncf %16 : vector<16x256xf32> to vector<16x256xbf16>
    %c0_12 = arith.constant 0 : index
    %c0_13 = arith.constant 0 : index
    %18 = vector.load %arg6[%c0_12, %c0_13] : memref<256x128xbf16, #tpu.memory_space<vmem>>, vector<256x128xbf16>
    %cst_14 = arith.constant dense<0.000000e+00> : vector<16x128xf32>
    %19 = tpu.matmul %17, %18, %cst_14 {dimension_numbers = #tpu.dot_dimension_numbers<[1], [0], [0], [1], [0, 0, 1, 1], [], []>} : vector<16x256xbf16>, vector<256x128xbf16>, vector<16x128xf32> -> vector<16x128xf32>
    %c0_15 = arith.constant 0 : index
    %c0_16 = arith.constant 0 : index
    %20 = vector.load %arg7[%c0_15, %c0_16] : memref<1x128xf32, #tpu.memory_space<vmem>>, vector<1x128xf32>
    %21 = vector.broadcast %20 : vector<1x128xf32> to vector<16x128xf32>
    %22 = arith.addf %19, %21 : vector<16x128xf32>
    %cst_17 = arith.constant 0.000000e+00 : f32
    %23 = vector.broadcast %cst_17 : f32 to vector<16x128xf32>
    %24 = arith.maximumf %22, %23 : vector<16x128xf32>
    %25 = arith.truncf %24 : vector<16x128xf32> to vector<16x128xbf16>
    %c0_18 = arith.constant 0 : index
    %c0_19 = arith.constant 0 : index
    %26 = vector.load %arg8[%c0_18, %c0_19] : memref<128x128xbf16, #tpu.memory_space<vmem>>, vector<128x128xbf16>
    %cst_20 = arith.constant dense<0.000000e+00> : vector<16x128xf32>
    %27 = tpu.matmul %25, %26, %cst_20 {dimension_numbers = #tpu.dot_dimension_numbers<[1], [0], [0], [1], [0, 0, 1, 1], [], []>} : vector<16x128xbf16>, vector<128x128xbf16>, vector<16x128xf32> -> vector<16x128xf32>
    %c0_21 = arith.constant 0 : index
    %c0_22 = arith.constant 0 : index
    %28 = vector.load %arg9[%c0_21, %c0_22] : memref<1x128xf32, #tpu.memory_space<vmem>>, vector<1x128xf32>
    %29 = vector.broadcast %28 : vector<1x128xf32> to vector<16x128xf32>
    %30 = arith.addf %27, %29 : vector<16x128xf32>
    %c0_23 = arith.constant 0 : index
    %c0_24 = arith.constant 0 : index
    %31 = vector.load %arg10[%c0_23, %c0_24] : memref<16x128xf32, #tpu.memory_space<vmem>>, vector<16x128xf32>
    tpu.vector_store %arg10[%c0_23, %c0_24], %30 {strides = array<i32>} : memref<16x128xf32, #tpu.memory_space<vmem>>, vector<16x128xf32>,
    return
  }
  func.func @transform_0(%arg0: i32) -> (i32, i32) {
    %c0_i32 = arith.constant 0 : i32
    %c0_i32_0 = arith.constant 0 : i32
    return %arg0, %c0_i32 : i32, i32
  }
  func.func @transform_1(%arg0: i32) -> (i32, i32) {
    %c0_i32 = arith.constant 0 : i32
    %c0_i32_0 = arith.constant 0 : i32
    %c0_i32_1 = arith.constant 0 : i32
    return %c0_i32, %c0_i32_0 : i32, i32
  }
  func.func @transform_2(%arg0: i32) -> (i32, i32) {
    %c0_i32 = arith.constant 0 : i32
    %c0_i32_0 = arith.constant 0 : i32
    %c0_i32_1 = arith.constant 0 : i32
    return %c0_i32, %c0_i32_0 : i32, i32
  }
  func.func @transform_3(%arg0: i32) -> (i32, i32) {
    %c0_i32 = arith.constant 0 : i32
    %c0_i32_0 = arith.constant 0 : i32
    %c0_i32_1 = arith.constant 0 : i32
    return %c0_i32, %c0_i32_0 : i32, i32
  }
  func.func @transform_4(%arg0: i32) -> (i32, i32) {
    %c0_i32 = arith.constant 0 : i32
    %c0_i32_0 = arith.constant 0 : i32
    %c0_i32_1 = arith.constant 0 : i32
    return %c0_i32, %c0_i32_0 : i32, i32
  }
  func.func @transform_5(%arg0: i32) -> (i32, i32) {
    %c0_i32 = arith.constant 0 : i32
    %c0_i32_0 = arith.constant 0 : i32
    %c0_i32_1 = arith.constant 0 : i32
    return %c0_i32, %c0_i32_0 : i32, i32
  }
  func.func @transform_6(%arg0: i32) -> (i32, i32) {
    %c0_i32 = arith.constant 0 : i32
    %c0_i32_0 = arith.constant 0 : i32
    %c0_i32_1 = arith.constant 0 : i32
    return %c0_i32, %c0_i32_0 : i32, i32
  }
  func.func @transform_7(%arg0: i32) -> (i32, i32) {
    %c0_i32 = arith.constant 0 : i32
    %c0_i32_0 = arith.constant 0 : i32
    %c0_i32_1 = arith.constant 0 : i32
    return %c0_i32, %c0_i32_0 : i32, i32
  }
  func.func @transform_8(%arg0: i32) -> (i32, i32) {
    %c0_i32 = arith.constant 0 : i32
    %c0_i32_0 = arith.constant 0 : i32
    %c0_i32_1 = arith.constant 0 : i32
    return %c0_i32, %c0_i32_0 : i32, i32
  }
  func.func @transform_9(%arg0: i32) -> (i32, i32) {
    %c0_i32 = arith.constant 0 : i32
    %c0_i32_0 = arith.constant 0 : i32
    return %arg0, %c0_i32 : i32, i32
  }
}

</mosaic_0001>

<bundles_post_ra>
// kernel: simple_model_forward.1
= control target key start
LH: loop header
LB: loop body
LE: loop exit
PB: predicated region body
PF: predicated region fallthrough
CT: control target
= control target key end

     0   :  { %14 = vsyncpa [#allocation3], 0  ;;  %v3940_v38 = vmov 1983009808   ;;  %v73_v40 = vlaneseq  ;;  %vm3942_vm0 = vmmov 0   ;;  %s5184_s0 = inlined_call_operand.vmem [shape: f32[2,1024], index: 0, kind: input, shape index: {}]   ;;  %s5185_s1 = inlined_call_operand.vmem [shape: bf16[1024,512], index: 1, kind: input, shape index: {}]   ;;  %s5186_s2 = inlined_call_operand.vmem [shape: f32[1,512], index: 2, kind: input, shape index: {}]   ;;  %s5187_s3 = inlined_call_operand.vmem [shape: bf16[512,256], index: 3, kind: input, shape index: {}]   ;;  %s5188_s4 = inlined_call_operand.vmem [shape: f32[1,256], index: 4, kind: input, shape index: {}]   ;;  %s5189_s5 = inlined_call_operand.vmem [shape: bf16[256,128], index: 5, kind: input, shape index: {}]   ;;  %s5190_s6 = inlined_call_operand.vmem [shape: f32[1,128], index: 6, kind: input, shape index: {}]   ;;  %s5191_s7 = inlined_call_operand.vmem [shape: bf16[128,128], index: 7, kind: input, shape index: {}]   ;;  %s5192_s8 = inlined_call_operand.vmem [shape: f32[1,128], index: 8, kind: input, shape index: {}]   ;;  %s5193_s9 = inlined_call_operand.hbm [shape: f32[2,128], index: 9, kind: output, shape index: {}]  }
   0x1   :  { %v3388_v0 = vld [vmem:[%s5185_s1 + $0x4] ss:$16 sps:$4 sm:$0xff]   ;;  %v3390_v1 = vld [vmem:[%s5185_s1 + $0xc] ss:$16 sps:$4 sm:$0xff]   ;;  %v3392_v2 = vld [vmem:[%s5185_s1] ss:$16 sps:$4 sm:$0xff]   ;;  %v71_v39 = vunpack.c.l.s4 %v3940_v38 }
   0x2   :  { %v3393_v3 = vld [vmem:[%s5185_s1 + $0x8] ss:$16 sps:$4 sm:$0xff]   ;;  %1792 = vmatprep.subr.bf16.mxu0 %v3388_v0  ;;  %v3394_v4 = vld [vmem:[%s5185_s1 + $0x24] ss:$16 sps:$4 sm:$0xff]   ;;  %1964 = vmatprep.subr.bf16.mxu1 %v3390_v1  ;;  %v3396_v5 = vld [vmem:[%s5185_s1 + $0x2c] ss:$16 sps:$4 sm:$0xff]  }
   0x3   :  { %1793 = vmatpush1.bf16.msra.mxu0 %v3392_v2  ;;  %1965 = vmatpush1.bf16.msra.mxu1 %v3393_v3  ;;  %v3398_v6 = vld [vmem:[%s5185_s1 + $0x20] ss:$16 sps:$4 sm:$0xff]   ;;  %v3399_v7 = vld [vmem:[%s5185_s1 + $0x28] ss:$16 sps:$4 sm:$0xff]   ;;  %v3400_v8 = vld [vmem:[%s5185_s1 + $0x44] ss:$16 sps:$4 sm:$0xff]   ;;  %v72_v46 = vunpack.c.0.s8 %v71_v39 }
   0x4   :  { %1794 = vmatprep.subr.bf16.mxu0 %v3394_v4  ;;  %1966 = vmatprep.subr.bf16.mxu1 %v3396_v5  ;;  %v3402_v9 = vld [vmem:[%s5185_s1 + $0x4c] ss:$16 sps:$4 sm:$0xff]   ;;  %v3404_v10 = vld [vmem:[%s5185_s1 + $0x40] ss:$16 sps:$4 sm:$0xff]   ;;  %v3405_v11 = vld [vmem:[%s5185_s1 + $0x48] ss:$16 sps:$4 sm:$0xff]  }
   0x5   :  { %v3406_v12 = vld [vmem:[%s5185_s1 + $0x64] ss:$16 sps:$4 sm:$0xff]   ;;  %v3408_v13 = vld [vmem:[%s5185_s1 + $0x6c] ss:$16 sps:$4 sm:$0xff]   ;;  %v3410_v14 = vld [vmem:[%s5185_s1 + $0x60] ss:$16 sps:$4 sm:$0xff]  }
   0x6   :  { %v3411_v15 = vld [vmem:[%s5185_s1 + $0x68] ss:$16 sps:$4 sm:$0xff]   ;;  %v3412_v16 = vld [vmem:[%s5185_s1 + $0x84] ss:$16 sps:$4 sm:$0xff]   ;;  %v3414_v17 = vld [vmem:[%s5185_s1 + $0x8c] ss:$16 sps:$4 sm:$0xff]  }
   0x7   :  { %1795 = vmatpush1.bf16.msra.mxu0 %v3398_v6  ;;  %1967 = vmatpush1.bf16.msra.mxu1 %v3399_v7  ;;  %v3416_v18 = vld [vmem:[%s5185_s1 + $0x80] ss:$16 sps:$4 sm:$0xff]   ;;  %v3417_v19 = vld [vmem:[%s5185_s1 + $0x88] ss:$16 sps:$4 sm:$0xff]   ;;  %v3418_v20 = vld [vmem:[%s5185_s1 + $0xa4] ss:$16 sps:$4 sm:$0xff]  }
   0x8   :  { %1796 = vmatprep.subr.bf16.mxu0 %v3400_v8  ;;  %1968 = vmatprep.subr.bf16.mxu1 %v3402_v9  ;;  %v3420_v21 = vld [vmem:[%s5185_s1 + $0xac] ss:$16 sps:$4 sm:$0xff]   ;;  %v3422_v22 = vld [vmem:[%s5185_s1 + $0xa0] ss:$16 sps:$4 sm:$0xff]   ;;  %v3423_v23 = vld [vmem:[%s5185_s1 + $0xa8] ss:$16 sps:$4 sm:$0xff]  }
   0x9   :  { %v3424_v24 = vld [vmem:[%s5185_s1 + $0xc4] ss:$16 sps:$4 sm:$0xff]   ;;  %v3426_v25 = vld [vmem:[%s5185_s1 + $0xcc] ss:$16 sps:$4 sm:$0xff]   ;;  %v3428_v26 = vld [vmem:[%s5185_s1 + $0xc0] ss:$16 sps:$4 sm:$0xff]  }
   0xa   :  { %v3429_v27 = vld [vmem:[%s5185_s1 + $0xc8] ss:$16 sps:$4 sm:$0xff]   ;;  %v3430_v28 = vld [vmem:[%s5185_s1 + $0xe4] ss:$16 sps:$4 sm:$0xff]   ;;  %v3432_v29 = vld [vmem:[%s5185_s1 + $0xec] ss:$16 sps:$4 sm:$0xff]  }
   0xb   :  { %1797 = vmatpush1.bf16.msra.mxu0 %v3404_v10  ;;  %1969 = vmatpush1.bf16.msra.mxu1 %v3405_v11  ;;  %v3434_v30 = vld [vmem:[%s5185_s1 + $0xe0] ss:$16 sps:$4 sm:$0xff]   ;;  %v3435_v31 = vld [vmem:[%s5185_s1 + $0xe8] ss:$16 sps:$4 sm:$0xff]   ;;  %v3436_v32 = vld [vmem:[%s5185_s1 + $0x104] ss:$16 sps:$4 sm:$0xff]  }
   0xc   :  { %1798 = vmatprep.subr.bf16.mxu0 %v3406_v12  ;;  %1970 = vmatprep.subr.bf16.mxu1 %v3408_v13  ;;  %v3438_v33 = vld [vmem:[%s5185_s1 + $0x10c] ss:$16 sps:$4 sm:$0xff]   ;;  %v3440_v34 = vld [vmem:[%s5185_s1 + $0x100] ss:$16 sps:$4 sm:$0xff]   ;;  %v3441_v35 = vld [vmem:[%s5185_s1 + $0x108] ss:$16 sps:$4 sm:$0xff]  }
   0xd   :  { %v3442_v36 = vld [vmem:[%s5185_s1 + $0x124] ss:$16 sps:$4 sm:$0xff]   ;;  %v3444_v37 = vld [vmem:[%s5185_s1 + $0x12c] ss:$16 sps:$4 sm:$0xff]   ;;  %v3446_v41 = vld [vmem:[%s5185_s1 + $0x120] ss:$16 sps:$4 sm:$0xff]  }
   0xe   :  { %v3447_v42 = vld [vmem:[%s5185_s1 + $0x128] ss:$16 sps:$4 sm:$0xff]   ;;  %v3448_v43 = vld [vmem:[%s5185_s1 + $0x144] ss:$16 sps:$4 sm:$0xff]   ;;  %v3450_v44 = vld [vmem:[%s5185_s1 + $0x14c] ss:$16 sps:$4 sm:$0xff]  }
   0xf   :  { %1799 = vmatpush1.bf16.msra.mxu0 %v3410_v14  ;;  %1971 = vmatpush1.bf16.msra.mxu1 %v3411_v15  ;;  %v3452_v45 = vld [vmem:[%s5185_s1 + $0x140] ss:$16 sps:$4 sm:$0xff]   ;;  %v4125_v47 = vshrl.u32 %v73_v40, 7  ;;  %v3453_v48 = vld [vmem:[%s5185_s1 + $0x148] ss:$16 sps:$4 sm:$0xff]  }
  0x10   :  { %1800 = vmatprep.subr.bf16.mxu0 %v3412_v16  ;;  %1972 = vmatprep.subr.bf16.mxu1 %v3414_v17  ;;  %v3454_v49 = vld [vmem:[%s5185_s1 + $0x164] ss:$16 sps:$4 sm:$0xff]   ;;  %v3456_v50 = vld [vmem:[%s5185_s1 + $0x16c] ss:$16 sps:$4 sm:$0xff]   ;;  %v3458_v51 = vld [vmem:[%s5185_s1 + $0x160] ss:$16 sps:$4 sm:$0xff]  }
  0x11   :  { %v3459_v52 = vld [vmem:[%s5185_s1 + $0x168] ss:$16 sps:$4 sm:$0xff]   ;;  %v3460_v53 = vld [vmem:[%s5185_s1 + $0x184] ss:$16 sps:$4 sm:$0xff]   ;;  %v4146_v54 = vsub.s32 %v72_v46, %v4125_v47  ;;  %v3484_v55 = vld [vmem:[%s5184_s0] ss:$16 sps:$4 sm:$0xff]  }
  0x12   :  { %v3462_v56 = vld [vmem:[%s5185_s1 + $0x18c] ss:$16 sps:$4 sm:$0xff]   ;;  %v3487_v57 = vld [vmem:[%s5184_s0 + $0x20] ss:$16 sps:$4 sm:$0xff]   ;;  %v3465_v63 = vld [vmem:[%s5185_s1 + $0x188] ss:$16 sps:$4 sm:$0xff]  }
  0x13   :  { %1801 = vmatpush1.bf16.msra.mxu0 %v3416_v18  ;;  %1973 = vmatpush1.bf16.msra.mxu1 %v3417_v19  ;;  %v76_v58 = vrot.slane %v3484_v55, %v4146_v54  ;;  %v3490_v59 = vld [vmem:[%s5184_s0 + $0x40] ss:$16 sps:$4 sm:$0xff]   ;;  %v90_v62 = vrot.slane %v3487_v57, %v4146_v54  ;;  %v3466_v0 = vld [vmem:[%s5185_s1 + $0x1a4] ss:$16 sps:$4 sm:$0xff]   ;;  %v3468_v3 = vld [vmem:[%s5185_s1 + $0x1ac] ss:$16 sps:$4 sm:$0xff]  }
  0x14   :  { %1802 = vmatprep.subr.bf16.mxu0 %v3418_v20  ;;  %1974 = vmatprep.subr.bf16.mxu1 %v3420_v21  ;;  %v3493_v60 = vld [vmem:[%s5184_s0 + $0x60] ss:$16 sps:$4 sm:$0xff]   ;;  %v148_v1 = vrot.slane %v3490_v59, %v4146_v54  ;;  %v3471_v6 = vld [vmem:[%s5185_s1 + $0x1a8] ss:$16 sps:$4 sm:$0xff]   ;;  %v3472_v7 = vld [vmem:[%s5185_s1 + $0x1c4] ss:$16 sps:$4 sm:$0xff]  }
  0x15   :  { %v3464_v61 = vld [vmem:[%s5185_s1 + $0x180] ss:$16 sps:$4 sm:$0xff]   ;;  %v162_v2 = vrot.slane %v3493_v60, %v4146_v54  ;;  %v99_v5 = vcombine.high %v76_v58, %v90_v62  ;;  %v3474_v9 = vld [vmem:[%s5185_s1 + $0x1cc] ss:$16 sps:$4 sm:$0xff]   ;;  %v3486_v10 = vld [vmem:[%s5184_s0 + $0x4] ss:$16 sps:$4 sm:$0xff]  }
  0x16   :  { %v3470_v4 = vld [vmem:[%s5185_s1 + $0x1a0] ss:$16 sps:$4 sm:$0xff]   ;;  %v3489_v11 = vld [vmem:[%s5184_s0 + $0x24] ss:$16 sps:$4 sm:$0xff]   ;;  %v3477_v16 = vld [vmem:[%s5185_s1 + $0x1c8] ss:$16 sps:$4 sm:$0xff]   ;;  %v4216_v19 = vrot.slane %v3486_v10, %v4146_v54 }
  0x17   :  { %1803 = vmatpush1.bf16.msra.mxu0 %v3422_v22  ;;  %1975 = vmatpush1.bf16.msra.mxu1 %v3423_v23  ;;  %v171_v8 = vcombine.high %v148_v1, %v162_v2  ;;  %v3492_v13 = vld [vmem:[%s5184_s0 + $0x44] ss:$16 sps:$4 sm:$0xff]   ;;  %v3476_v15 = vld [vmem:[%s5185_s1 + $0x1c0] ss:$16 sps:$4 sm:$0xff]   ;;  %v3480_v18 = vld [vmem:[%s5185_s1 + $0x1ec] ss:$16 sps:$4 sm:$0xff]   ;;  %v4219_v20 = vrot.slane %v3489_v11, %v4146_v54  ;;  %v98_v23 = vcombine.low %v76_v58, %v90_v62 }
  0x18   :  { %1804 = vmatprep.subr.bf16.mxu0 %v3424_v24  ;;  %1976 = vmatprep.subr.bf16.mxu1 %v3426_v25  ;;  %v3495_v14 = vld [vmem:[%s5184_s0 + $0x64] ss:$16 sps:$4 sm:$0xff]   ;;  %v4222_v21 = vrot.slane %v3492_v13, %v4146_v54  ;;  %v170_v24 = vcombine.low %v148_v1, %v162_v2  ;;  %v3482_v25 = vld [vmem:[%s5185_s1 + $0x1e0] ss:$16 sps:$4 sm:$0xff]   ;;  %v3505_v38 = vld [vmem:[%s5185_s1 + $0x228] ss:$16 sps:$4 sm:$0xff]  }
  0x19   :  { %v227_v12 = vpack.c.bf16 %v171_v8, %v99_v5  ;;  %v3478_v17 = vld [vmem:[%s5185_s1 + $0x1e4] ss:$16 sps:$4 sm:$0xff]   ;;  %v4225_v22 = vrot.slane %v3495_v14, %v4146_v54  ;;  %v3513_v40 = vld [vmem:[%s5185_s1 + $0x24c] ss:$16 sps:$4 sm:$0xff]   ;;  %v3517_v46 = vld [vmem:[%s5185_s1 + $0x268] ss:$16 sps:$4 sm:$0xff]  }
  0x1a   :  { %v3510_v39 = vld [vmem:[%s5185_s1 + $0x244] ss:$16 sps:$4 sm:$0xff]   ;;  %v3526_v55 = vld [vmem:[%s5185_s1 + $0x2a0] ss:$16 sps:$4 sm:$0xff]   ;;  %v3537_v58 = vld [vmem:[%s5185_s1 + $0x2cc] ss:$16 sps:$4 sm:$0xff]  }
  0x1b   :  { %1805 = vmatpush1.bf16.msra.mxu0 %v3428_v26  ;;  %1977 = vmatpush1.bf16.msra.mxu1 %v3429_v27  ;;  %v3483_v26 = vld [vmem:[%s5185_s1 + $0x1e8] ss:$16 sps:$4 sm:$0xff]   ;;  %v3498_v27 = vld [vmem:[%s5185_s1 + $0x204] ss:$16 sps:$4 sm:$0xff]   ;;  %v3532_v59 = vld [vmem:[%s5185_s1 + $0x2c0] ss:$16 sps:$4 sm:$0xff]  }
  0x1c   :  { %1806 = vmatprep.subr.bf16.mxu0 %v3430_v28  ;;  %1978 = vmatprep.subr.bf16.mxu1 %v3432_v29  ;;  %v3501_v28 = vld [vmem:[%s5185_s1 + $0x20c] ss:$16 sps:$4 sm:$0xff]   ;;  %v101_v29 = vcombine.high %v4216_v19, %v4219_v20  ;;  %v3534_v57 = vld [vmem:[%s5185_s1 + $0x2c4] ss:$16 sps:$4 sm:$0xff]   ;;  %v3535_v60 = vld [vmem:[%s5185_s1 + $0x2c8] ss:$16 sps:$4 sm:$0xff]  }
  0x1d   :  { %1824 = vmatprep.mubr.bf16.mxu0 %v227_v12  ;;  %1996 = vmatprep.mubr.bf16.mxu1 %v227_v12  ;;  %v3543_v62 = vld [vmem:[%s5185_s1 + $0x2ec] ss:$16 sps:$4 sm:$0xff]   ;;  %v3546_v1 = vld [vmem:[%s5185_s1 + $0x304] ss:$16 sps:$4 sm:$0xff]   ;;  %v3553_v8 = vld [vmem:[%s5185_s1 + $0x328] ss:$16 sps:$4 sm:$0xff]  }
  0x1e   :  { %v3549_v2 = vld [vmem:[%s5185_s1 + $0x30c] ss:$16 sps:$4 sm:$0xff]   ;;  %v3552_v5 = vld [vmem:[%s5185_s1 + $0x324] ss:$16 sps:$4 sm:$0xff]   ;;  %v3556_v11 = vld [vmem:[%s5185_s1 + $0x340] ss:$16 sps:$4 sm:$0xff]  }
  0x1f   :  { %1807 = vmatpush1.bf16.msra.mxu0 %v3434_v30  ;;  %1979 = vmatpush1.bf16.msra.mxu1 %v3435_v31  ;;  %v173_v30 = vcombine.high %v4222_v21, %v4225_v22  ;;  %v226_v31 = vpack.c.bf16 %v170_v24, %v98_v23  ;;  %v3561_v10 = vld [vmem:[%s5185_s1 + $0x34c] ss:$16 sps:$4 sm:$0xff]   ;;  %v3559_v12 = vld [vmem:[%s5185_s1 + $0x348] ss:$16 sps:$4 sm:$0xff]   ;;  %v3564_v13 = vld [vmem:[%s5185_s1 + $0x364] ss:$16 sps:$4 sm:$0xff]  }
  0x20   :  { %1808 = vmatprep.subr.bf16.mxu0 %v3436_v32  ;;  %1980 = vmatprep.subr.bf16.mxu1 %v3438_v33  ;;  %v3496_v32 = vld [vmem:[%s5185_s1 + $0x200] ss:$16 sps:$4 sm:$0xff]   ;;  %v3499_v33 = vld [vmem:[%s5185_s1 + $0x208] ss:$16 sps:$4 sm:$0xff]   ;;  %v3567_v14 = vld [vmem:[%s5185_s1 + $0x36c] ss:$16 sps:$4 sm:$0xff]  }
  0x21   :  { %v3568_v23 = vld [vmem:[%s5185_s1 + $0x380] ss:$16 sps:$4 sm:$0xff]   ;;  %v3571_v24 = vld [vmem:[%s5185_s1 + $0x388] ss:$16 sps:$4 sm:$0xff]  }
  0x23   :  { %1809 = vmatpush1.bf16.msra.mxu0 %v3440_v34  ;;  %1981 = vmatpush1.bf16.msra.mxu1 %v3441_v35  ;;  %v3504_v34 = vld [vmem:[%s5185_s1 + $0x224] ss:$16 sps:$4 sm:$0xff]   ;;  %v3507_v35 = vld [vmem:[%s5185_s1 + $0x22c] ss:$16 sps:$4 sm:$0xff]  }
  0x24   :  { %1810 = vmatprep.subr.bf16.mxu0 %v3442_v36  ;;  %1982 = vmatprep.subr.bf16.mxu1 %v3444_v37  ;;  %v229_v36 = vpack.c.bf16 %v173_v30, %v101_v29  ;;  %v3502_v37 = vld [vmem:[%s5185_s1 + $0x220] ss:$16 sps:$4 sm:$0xff]   ;;  %v3582_v29 = vld [vmem:[%s5185_s1 + $0x3c4] ss:$16 sps:$4 sm:$0xff]   ;;  %v3585_v30 = vld [vmem:[%s5185_s1 + $0x3cc] ss:$16 sps:$4 sm:$0xff]  }
  0x27   :  { %1811 = vmatpush1.bf16.msra.mxu0 %v3446_v41  ;;  %1983 = vmatpush1.bf16.msra.mxu1 %v3447_v42  ;;  %v3508_v41 = vld [vmem:[%s5185_s1 + $0x240] ss:$16 sps:$4 sm:$0xff]   ;;  %v3511_v42 = vld [vmem:[%s5185_s1 + $0x248] ss:$16 sps:$4 sm:$0xff]  }
  0x28   :  { %1812 = vmatprep.subr.bf16.mxu0 %v3448_v43  ;;  %1984 = vmatprep.subr.bf16.mxu1 %v3450_v44  ;;  %v3516_v43 = vld [vmem:[%s5185_s1 + $0x264] ss:$16 sps:$4 sm:$0xff]   ;;  %v3519_v44 = vld [vmem:[%s5185_s1 + $0x26c] ss:$16 sps:$4 sm:$0xff]  }
  0x2b   :  { %1813 = vmatpush1.bf16.msra.mxu0 %v3452_v45  ;;  %1985 = vmatpush1.bf16.msra.mxu1 %v3453_v48  ;;  %v3514_v45 = vld [vmem:[%s5185_s1 + $0x260] ss:$16 sps:$4 sm:$0xff]   ;;  %v3522_v48 = vld [vmem:[%s5185_s1 + $0x284] ss:$16 sps:$4 sm:$0xff]  }
  0x2c   :  { %1814 = vmatprep.subr.bf16.mxu0 %v3454_v49  ;;  %1986 = vmatprep.subr.bf16.mxu1 %v3456_v50  ;;  %v3525_v49 = vld [vmem:[%s5185_s1 + $0x28c] ss:$16 sps:$4 sm:$0xff]   ;;  %v3520_v50 = vld [vmem:[%s5185_s1 + $0x280] ss:$16 sps:$4 sm:$0xff]  }
  0x2f   :  { %1815 = vmatpush1.bf16.msra.mxu0 %v3458_v51  ;;  %1987 = vmatpush1.bf16.msra.mxu1 %v3459_v52  ;;  %v3523_v51 = vld [vmem:[%s5185_s1 + $0x288] ss:$16 sps:$4 sm:$0xff]   ;;  %v3528_v52 = vld [vmem:[%s5185_s1 + $0x2a4] ss:$16 sps:$4 sm:$0xff]  }
  0x30   :  { %1816 = vmatprep.subr.bf16.mxu0 %v3460_v53  ;;  %1988 = vmatprep.subr.bf16.mxu1 %v3462_v56  ;;  %v3531_v53 = vld [vmem:[%s5185_s1 + $0x2ac] ss:$16 sps:$4 sm:$0xff]   ;;  %v3529_v56 = vld [vmem:[%s5185_s1 + $0x2a8] ss:$16 sps:$4 sm:$0xff]  }
  0x33   :  { %1817 = vmatpush1.bf16.msra.mxu0 %v3464_v61  ;;  %1989 = vmatpush1.bf16.msra.mxu1 %v3465_v63  ;;  %v3540_v61 = vld [vmem:[%s5185_s1 + $0x2e4] ss:$16 sps:$4 sm:$0xff]   ;;  %v3538_v63 = vld [vmem:[%s5185_s1 + $0x2e0] ss:$16 sps:$4 sm:$0xff]  }
  0x34   :  { %1818 = vmatprep.subr.bf16.mxu0 %v3466_v0  ;;  %1990 = vmatprep.subr.bf16.mxu1 %v3468_v3  ;;  %v3541_v0 = vld [vmem:[%s5185_s1 + $0x2e8] ss:$16 sps:$4 sm:$0xff]   ;;  %v3544_v3 = vld [vmem:[%s5185_s1 + $0x300] ss:$16 sps:$4 sm:$0xff]  }
  0x37   :  { %1819 = vmatpush1.bf16.msra.mxu0 %v3470_v4  ;;  %1991 = vmatpush1.bf16.msra.mxu1 %v3471_v6  ;;  %v3547_v4 = vld [vmem:[%s5185_s1 + $0x308] ss:$16 sps:$4 sm:$0xff]   ;;  %v3555_v6 = vld [vmem:[%s5185_s1 + $0x32c] ss:$16 sps:$4 sm:$0xff]  }
  0x38   :  { %1820 = vmatprep.subr.bf16.mxu0 %v3472_v7  ;;  %1992 = vmatprep.subr.bf16.mxu1 %v3474_v9  ;;  %v3550_v7 = vld [vmem:[%s5185_s1 + $0x320] ss:$16 sps:$4 sm:$0xff]   ;;  %v3558_v9 = vld [vmem:[%s5185_s1 + $0x344] ss:$16 sps:$4 sm:$0xff]  }
  0x3b   :  { %1821 = vmatpush1.bf16.msra.mxu0 %v3476_v15  ;;  %1993 = vmatpush1.bf16.msra.mxu1 %v3477_v16  ;;  %v3562_v15 = vld [vmem:[%s5185_s1 + $0x360] ss:$16 sps:$4 sm:$0xff]   ;;  %v3565_v16 = vld [vmem:[%s5185_s1 + $0x368] ss:$16 sps:$4 sm:$0xff]  }
  0x3c   :  { %1822 = vmatprep.subr.bf16.mxu0 %v3478_v17  ;;  %1994 = vmatprep.subr.bf16.mxu1 %v3480_v18  ;;  %v3570_v17 = vld [vmem:[%s5185_s1 + $0x384] ss:$16 sps:$4 sm:$0xff]   ;;  %v3573_v18 = vld [vmem:[%s5185_s1 + $0x38c] ss:$16 sps:$4 sm:$0xff]  }
  0x3f   :  { %1823 = vmatpush1.bf16.msra.mxu0 %v3482_v25  ;;  %1995 = vmatpush1.bf16.msra.mxu1 %v3483_v26  ;;  %v3576_v25 = vld [vmem:[%s5185_s1 + $0x3a4] ss:$16 sps:$4 sm:$0xff]   ;;  %v3579_v26 = vld [vmem:[%s5185_s1 + $0x3ac] ss:$16 sps:$4 sm:$0xff]  }
  0x40   :  { %1835 = vmatprep.subr.bf16.mxu0 %v3498_v27  ;;  %2007 = vmatprep.subr.bf16.mxu1 %v3501_v28  ;;  %v3574_v27 = vld [vmem:[%s5185_s1 + $0x3a0] ss:$16 sps:$4 sm:$0xff]   ;;  %v3577_v28 = vld [vmem:[%s5185_s1 + $0x3a8] ss:$16 sps:$4 sm:$0xff]  }
  0x42   :  { %1825 = vmatmul.mubr.bf16.vlgmr.msra.gmra.mrb[0].mxu0 %v226_v31  ;;  %1997 = vmatmul.mubr.bf16.vlgmr.msra.gmra.mrb[0].mxu1 %v226_v31  ;;  %v3580_v31 = vld [vmem:[%s5185_s1 + $0x3c0] ss:$16 sps:$4 sm:$0xff]  }
  0x43   :  { %1836 = vmatpush1.bf16.msra.mxu0 %v3496_v32  ;;  %2008 = vmatpush1.bf16.msra.mxu1 %v3499_v33  ;;  %v3583_v32 = vld [vmem:[%s5185_s1 + $0x3c8] ss:$16 sps:$4 sm:$0xff]   ;;  %v3588_v33 = vld [vmem:[%s5185_s1 + $0x3e4] ss:$16 sps:$4 sm:$0xff]  }
  0x44   :  { %1837 = vmatprep.subr.bf16.mxu0 %v3504_v34  ;;  %2009 = vmatprep.subr.bf16.mxu1 %v3507_v35  ;;  %v3591_v34 = vld [vmem:[%s5185_s1 + $0x3ec] ss:$16 sps:$4 sm:$0xff]   ;;  %v100_v35 = vcombine.low %v4216_v19, %v4219_v20 }
  0x45   :  { %1867 = vmatprep.mubr.bf16.mxu0 %v229_v36  ;;  %2039 = vmatprep.mubr.bf16.mxu1 %v229_v36  ;;  %v172_v36 = vcombine.low %v4222_v21, %v4225_v22  ;;  %v3597_v19 = vld [vmem:[%s5185_s1 + $0x40c] ss:$16 sps:$4 sm:$0xff]   ;;  %v3592_v21 = vld [vmem:[%s5185_s1 + $0x400] ss:$16 sps:$4 sm:$0xff]   ;;  %v3595_v22 = vld [vmem:[%s5185_s1 + $0x408] ss:$16 sps:$4 sm:$0xff]  }
  0x47   :  { %1838 = vmatpush1.bf16.msra.mxu0 %v3502_v37  ;;  %2010 = vmatpush1.bf16.msra.mxu1 %v3505_v38  ;;  %v3586_v37 = vld [vmem:[%s5185_s1 + $0x3e0] ss:$16 sps:$4 sm:$0xff]   ;;  %v3589_v38 = vld [vmem:[%s5185_s1 + $0x3e8] ss:$16 sps:$4 sm:$0xff]   ;;  %v228_v20 = vpack.c.bf16 %v172_v36, %v100_v35 }
  0x48   :  { %1839 = vmatprep.subr.bf16.mxu0 %v3510_v39  ;;  %2011 = vmatprep.subr.bf16.mxu1 %v3513_v40  ;;  %v3594_v39 = vld [vmem:[%s5185_s1 + $0x404] ss:$16 sps:$4 sm:$0xff]   ;;  %v3658_v35 = vld [vmem:[%s5185_s1 + $0x560] ss:$16 sps:$4 sm:$0xff]   ;;  %v3661_v36 = vld [vmem:[%s5185_s1 + $0x568] ss:$16 sps:$4 sm:$0xff]  }
  0x49   :  { %v3600_v40 = vld [vmem:[%s5185_s1 + $0x424] ss:$16 sps:$4 sm:$0xff]  }
  0x4b   :  { %1840 = vmatpush1.bf16.msra.mxu0 %v3508_v41  ;;  %2012 = vmatpush1.bf16.msra.mxu1 %v3511_v42  ;;  %v3603_v41 = vld [vmem:[%s5185_s1 + $0x42c] ss:$16 sps:$4 sm:$0xff]   ;;  %v3598_v42 = vld [vmem:[%s5185_s1 + $0x420] ss:$16 sps:$4 sm:$0xff]  }
  0x4c   :  { %1841 = vmatprep.subr.bf16.mxu0 %v3516_v43  ;;  %2013 = vmatprep.subr.bf16.mxu1 %v3519_v44  ;;  %v3601_v43 = vld [vmem:[%s5185_s1 + $0x428] ss:$16 sps:$4 sm:$0xff]   ;;  %v3606_v44 = vld [vmem:[%s5185_s1 + $0x444] ss:$16 sps:$4 sm:$0xff]  }
  0x4f   :  { %1842 = vmatpush1.bf16.msra.mxu0 %v3514_v45  ;;  %2014 = vmatpush1.bf16.msra.mxu1 %v3517_v46  ;;  %v3609_v45 = vld [vmem:[%s5185_s1 + $0x44c] ss:$16 sps:$4 sm:$0xff]   ;;  %v3604_v46 = vld [vmem:[%s5185_s1 + $0x440] ss:$16 sps:$4 sm:$0xff]  }
  0x50   :  { %1843 = vmatprep.subr.bf16.mxu0 %v3522_v48  ;;  %2015 = vmatprep.subr.bf16.mxu1 %v3525_v49  ;;  %v3607_v48 = vld [vmem:[%s5185_s1 + $0x448] ss:$16 sps:$4 sm:$0xff]   ;;  %v3612_v49 = vld [vmem:[%s5185_s1 + $0x464] ss:$16 sps:$4 sm:$0xff]  }
  0x53   :  { %1844 = vmatpush1.bf16.msra.mxu0 %v3520_v50  ;;  %2016 = vmatpush1.bf16.msra.mxu1 %v3523_v51  ;;  %v3688_v50 = vld [vmem:[%s5184_s0 + $0x8] ss:$16 sps:$4 sm:$0xff]  }
  0x54   :  { %1845 = vmatprep.subr.bf16.mxu0 %v3528_v52  ;;  %2017 = vmatprep.subr.bf16.mxu1 %v3531_v53  ;;  %v3690_v51 = vld [vmem:[%s5184_s0 + $0x28] ss:$16 sps:$4 sm:$0xff]  }
  0x55   :  { %v3692_v52 = vld [vmem:[%s5184_s0 + $0x48] ss:$16 sps:$4 sm:$0xff]  }
  0x56   :  { %v3694_v53 = vld [vmem:[%s5184_s0 + $0x68] ss:$16 sps:$4 sm:$0xff]  }
  0x57   :  { %1846 = vmatpush1.bf16.msra.mxu0 %v3526_v55  ;;  %2018 = vmatpush1.bf16.msra.mxu1 %v3529_v56  ;;  %v3615_v55 = vld [vmem:[%s5185_s1 + $0x46c] ss:$16 sps:$4 sm:$0xff]   ;;  %v4488_v56 = vrot.slane %v3688_v50, %v4146_v54  ;;  %v3684_v50 = vld [vmem:[%s5185_s1 + $0x5e4] ss:$16 sps:$4 sm:$0xff]  }
  0x58   :  { %1847 = vmatprep.subr.bf16.mxu0 %v3534_v57  ;;  %2019 = vmatprep.subr.bf16.mxu1 %v3537_v58  ;;  %v4491_v57 = vrot.slane %v3690_v51, %v4146_v54  ;;  %v4494_v58 = vrot.slane %v3692_v52, %v4146_v54  ;;  %v3687_v51 = vld [vmem:[%s5185_s1 + $0x5ec] ss:$16 sps:$4 sm:$0xff]  }
  0x5b   :  { %1848 = vmatpush1.bf16.msra.mxu0 %v3532_v59  ;;  %2020 = vmatpush1.bf16.msra.mxu1 %v3535_v60  ;;  %v4497_v59 = vrot.slane %v3694_v53, %v4146_v54  ;;  %v3610_v60 = vld [vmem:[%s5185_s1 + $0x460] ss:$16 sps:$4 sm:$0xff]  }
  0x5c   :  { %1849 = vmatprep.subr.bf16.mxu0 %v3540_v61  ;;  %2021 = vmatprep.subr.bf16.mxu1 %v3543_v62  ;;  %v135_v61 = vcombine.high %v4488_v56, %v4491_v57  ;;  %v3613_v62 = vld [vmem:[%s5185_s1 + $0x468] ss:$16 sps:$4 sm:$0xff]  }
  0x5f   :  { %1850 = vmatpush1.bf16.msra.mxu0 %v3538_v63  ;;  %2022 = vmatpush1.bf16.msra.mxu1 %v3541_v0  ;;  %v3618_v63 = vld [vmem:[%s5185_s1 + $0x484] ss:$16 sps:$4 sm:$0xff]   ;;  %v207_v0 = vcombine.high %v4494_v58, %v4497_v59 }
  0x60   :  { %1851 = vmatprep.subr.bf16.mxu0 %v3546_v1  ;;  %2023 = vmatprep.subr.bf16.mxu1 %v3549_v2  ;;  %v3621_v1 = vld [vmem:[%s5185_s1 + $0x48c] ss:$16 sps:$4 sm:$0xff]  }
  0x61   :  { %v231_v2 = vpack.c.bf16 %v207_v0, %v135_v61  ;;  %v134_v61 = vcombine.low %v4488_v56, %v4491_v57  ;;  %v3685_v0 = vld [vmem:[%s5185_s1 + $0x5e8] ss:$16 sps:$4 sm:$0xff]   ;;  %v3701_v56 = vld [vmem:[%s5185_s1 + $0x60c] ss:$16 sps:$4 sm:$0xff]  }
  0x63   :  { %1852 = vmatpush1.bf16.msra.mxu0 %v3544_v3  ;;  %2024 = vmatpush1.bf16.msra.mxu1 %v3547_v4  ;;  %v3616_v3 = vld [vmem:[%s5185_s1 + $0x480] ss:$16 sps:$4 sm:$0xff]   ;;  %v3619_v4 = vld [vmem:[%s5185_s1 + $0x488] ss:$16 sps:$4 sm:$0xff]  }
  0x64   :  { %1853 = vmatprep.subr.bf16.mxu0 %v3552_v5  ;;  %2025 = vmatprep.subr.bf16.mxu1 %v3555_v6  ;;  %v3624_v5 = vld [vmem:[%s5185_s1 + $0x4a4] ss:$16 sps:$4 sm:$0xff]   ;;  %v3627_v6 = vld [vmem:[%s5185_s1 + $0x4ac] ss:$16 sps:$4 sm:$0xff]  }
  0x67   :  { %1854 = vmatpush1.bf16.msra.mxu0 %v3550_v7  ;;  %2026 = vmatpush1.bf16.msra.mxu1 %v3553_v8  ;;  %v3622_v7 = vld [vmem:[%s5185_s1 + $0x4a0] ss:$16 sps:$4 sm:$0xff]   ;;  %v3625_v8 = vld [vmem:[%s5185_s1 + $0x4a8] ss:$16 sps:$4 sm:$0xff]  }
  0x68   :  { %1855 = vmatprep.subr.bf16.mxu0 %v3558_v9  ;;  %2027 = vmatprep.subr.bf16.mxu1 %v3561_v10  ;;  %v3630_v9 = vld [vmem:[%s5185_s1 + $0x4c4] ss:$16 sps:$4 sm:$0xff]   ;;  %v3633_v10 = vld [vmem:[%s5185_s1 + $0x4cc] ss:$16 sps:$4 sm:$0xff]  }
  0x6b   :  { %1856 = vmatpush1.bf16.msra.mxu0 %v3556_v11  ;;  %2028 = vmatpush1.bf16.msra.mxu1 %v3559_v12  ;;  %v3628_v11 = vld [vmem:[%s5185_s1 + $0x4c0] ss:$16 sps:$4 sm:$0xff]   ;;  %v3631_v12 = vld [vmem:[%s5185_s1 + $0x4c8] ss:$16 sps:$4 sm:$0xff]  }
  0x6c   :  { %1857 = vmatprep.subr.bf16.mxu0 %v3564_v13  ;;  %2029 = vmatprep.subr.bf16.mxu1 %v3567_v14  ;;  %v3636_v13 = vld [vmem:[%s5185_s1 + $0x4e4] ss:$16 sps:$4 sm:$0xff]   ;;  %v3639_v14 = vld [vmem:[%s5185_s1 + $0x4ec] ss:$16 sps:$4 sm:$0xff]  }
  0x6f   :  { %1858 = vmatpush1.bf16.msra.mxu0 %v3562_v15  ;;  %2030 = vmatpush1.bf16.msra.mxu1 %v3565_v16  ;;  %v3634_v15 = vld [vmem:[%s5185_s1 + $0x4e0] ss:$16 sps:$4 sm:$0xff]   ;;  %v3637_v16 = vld [vmem:[%s5185_s1 + $0x4e8] ss:$16 sps:$4 sm:$0xff]  }
  0x70   :  { %1859 = vmatprep.subr.bf16.mxu0 %v3570_v17  ;;  %2031 = vmatprep.subr.bf16.mxu1 %v3573_v18  ;;  %v3642_v17 = vld [vmem:[%s5185_s1 + $0x504] ss:$16 sps:$4 sm:$0xff]   ;;  %v3645_v18 = vld [vmem:[%s5185_s1 + $0x50c] ss:$16 sps:$4 sm:$0xff]  }
  0x73   :  { %1860 = vmatpush1.bf16.msra.mxu0 %v3568_v23  ;;  %2032 = vmatpush1.bf16.msra.mxu1 %v3571_v24  ;;  %v3640_v23 = vld [vmem:[%s5185_s1 + $0x500] ss:$16 sps:$4 sm:$0xff]   ;;  %v3643_v24 = vld [vmem:[%s5185_s1 + $0x508] ss:$16 sps:$4 sm:$0xff]  }
  0x74   :  { %1861 = vmatprep.subr.bf16.mxu0 %v3576_v25  ;;  %2033 = vmatprep.subr.bf16.mxu1 %v3579_v26  ;;  %v3648_v25 = vld [vmem:[%s5185_s1 + $0x524] ss:$16 sps:$4 sm:$0xff]   ;;  %v3651_v26 = vld [vmem:[%s5185_s1 + $0x52c] ss:$16 sps:$4 sm:$0xff]  }
  0x77   :  { %1862 = vmatpush1.bf16.msra.mxu0 %v3574_v27  ;;  %2034 = vmatpush1.bf16.msra.mxu1 %v3577_v28  ;;  %v3646_v27 = vld [vmem:[%s5185_s1 + $0x520] ss:$16 sps:$4 sm:$0xff]   ;;  %v3649_v28 = vld [vmem:[%s5185_s1 + $0x528] ss:$16 sps:$4 sm:$0xff]  }
  0x78   :  { %1863 = vmatprep.subr.bf16.mxu0 %v3582_v29  ;;  %2035 = vmatprep.subr.bf16.mxu1 %v3585_v30  ;;  %v3654_v29 = vld [vmem:[%s5185_s1 + $0x544] ss:$16 sps:$4 sm:$0xff]   ;;  %v3657_v30 = vld [vmem:[%s5185_s1 + $0x54c] ss:$16 sps:$4 sm:$0xff]  }
  0x7b   :  { %1864 = vmatpush1.bf16.msra.mxu0 %v3580_v31  ;;  %2036 = vmatpush1.bf16.msra.mxu1 %v3583_v32  ;;  %v3652_v31 = vld [vmem:[%s5185_s1 + $0x540] ss:$16 sps:$4 sm:$0xff]   ;;  %v3655_v32 = vld [vmem:[%s5185_s1 + $0x548] ss:$16 sps:$4 sm:$0xff]  }
  0x7c   :  { %1865 = vmatprep.subr.bf16.mxu0 %v3588_v33  ;;  %2037 = vmatprep.subr.bf16.mxu1 %v3591_v34  ;;  %v3660_v33 = vld [vmem:[%s5185_s1 + $0x564] ss:$16 sps:$4 sm:$0xff]   ;;  %v3663_v34 = vld [vmem:[%s5185_s1 + $0x56c] ss:$16 sps:$4 sm:$0xff]  }
  0x7f   :  { %1866 = vmatpush1.bf16.msra.mxu0 %v3586_v37  ;;  %2038 = vmatpush1.bf16.msra.mxu1 %v3589_v38  ;;  %v3666_v37 = vld [vmem:[%s5185_s1 + $0x584] ss:$16 sps:$4 sm:$0xff]   ;;  %v3669_v38 = vld [vmem:[%s5185_s1 + $0x58c] ss:$16 sps:$4 sm:$0xff]  }
  0x80   :  { %1878 = vmatprep.subr.bf16.mxu0 %v3594_v39  ;;  %2050 = vmatprep.subr.bf16.mxu1 %v3597_v19  ;;  %v3664_v39 = vld [vmem:[%s5185_s1 + $0x580] ss:$16 sps:$4 sm:$0xff]   ;;  %v3667_v19 = vld [vmem:[%s5185_s1 + $0x588] ss:$16 sps:$4 sm:$0xff]  }
  0x82   :  { %1868 = vmatmul.mubr.bf16.vlgmr.msra.gmra.mrb[0].mxu0 %v228_v20  ;;  %2040 = vmatmul.mubr.bf16.vlgmr.msra.gmra.mrb[0].mxu1 %v228_v20  ;;  %v3672_v20 = vld [vmem:[%s5185_s1 + $0x5a4] ss:$16 sps:$4 sm:$0xff]  }
  0x83   :  { %1879 = vmatpush1.bf16.msra.mxu0 %v3592_v21  ;;  %2051 = vmatpush1.bf16.msra.mxu1 %v3595_v22  ;;  %v3675_v21 = vld [vmem:[%s5185_s1 + $0x5ac] ss:$16 sps:$4 sm:$0xff]   ;;  %v3670_v22 = vld [vmem:[%s5185_s1 + $0x5a0] ss:$16 sps:$4 sm:$0xff]  }
  0x84   :  { %1880 = vmatprep.subr.bf16.mxu0 %v3600_v40  ;;  %2052 = vmatprep.subr.bf16.mxu1 %v3603_v41  ;;  %v3673_v40 = vld [vmem:[%s5185_s1 + $0x5a8] ss:$16 sps:$4 sm:$0xff]   ;;  %v3678_v41 = vld [vmem:[%s5185_s1 + $0x5c4] ss:$16 sps:$4 sm:$0xff]  }
  0x85   :  { %1910 = vmatprep.mubr.bf16.mxu0 %v231_v2  ;;  %2082 = vmatprep.mubr.bf16.mxu1 %v231_v2  ;;  %v3699_v2 = vld [vmem:[%s5185_s1 + $0x608] ss:$16 sps:$4 sm:$0xff]  }
  0x87   :  { %1881 = vmatpush1.bf16.msra.mxu0 %v3598_v42  ;;  %2053 = vmatpush1.bf16.msra.mxu1 %v3601_v43  ;;  %v3681_v42 = vld [vmem:[%s5185_s1 + $0x5cc] ss:$16 sps:$4 sm:$0xff]  }
  0x88   :  { %1882 = vmatprep.subr.bf16.mxu0 %v3606_v44  ;;  %2054 = vmatprep.subr.bf16.mxu1 %v3609_v45  ;;  %v3792_v43 = vld [vmem:[%s5184_s0 + $0xc] ss:$16 sps:$4 sm:$0xff]  }
  0x89   :  { %v3793_v44 = vld [vmem:[%s5184_s0 + $0x2c] ss:$16 sps:$4 sm:$0xff]   ;;  %v4660_v52 = vrot.slane %v3792_v43, %v4146_v54  ;;  %v3759_v43 = vld [vmem:[%s5185_s1 + $0x748] ss:$16 sps:$4 sm:$0xff]  }
  0x8a   :  { %v3794_v45 = vld [vmem:[%s5184_s0 + $0x4c] ss:$16 sps:$4 sm:$0xff]   ;;  %v4663_v53 = vrot.slane %v3793_v44, %v4146_v54  ;;  %v3764_v44 = vld [vmem:[%s5185_s1 + $0x764] ss:$16 sps:$4 sm:$0xff]  }
  0x8b   :  { %1883 = vmatpush1.bf16.msra.mxu0 %v3604_v46  ;;  %2055 = vmatpush1.bf16.msra.mxu1 %v3607_v48  ;;  %v3795_v46 = vld [vmem:[%s5184_s0 + $0x6c] ss:$16 sps:$4 sm:$0xff]   ;;  %v3676_v48 = vld [vmem:[%s5185_s1 + $0x5c0] ss:$16 sps:$4 sm:$0xff]  }
  0x8c   :  { %1884 = vmatprep.subr.bf16.mxu0 %v3612_v49  ;;  %2056 = vmatprep.subr.bf16.mxu1 %v3615_v55  ;;  %v3679_v49 = vld [vmem:[%s5185_s1 + $0x5c8] ss:$16 sps:$4 sm:$0xff]   ;;  %v4666_v55 = vrot.slane %v3794_v45, %v4146_v54  ;;  %v137_v57 = vcombine.high %v4660_v52, %v4663_v53  ;;  %v3767_v45 = vld [vmem:[%s5185_s1 + $0x76c] ss:$16 sps:$4 sm:$0xff]  }
  0x8f   :  { %1885 = vmatpush1.bf16.msra.mxu0 %v3610_v60  ;;  %2057 = vmatpush1.bf16.msra.mxu1 %v3613_v62  ;;  %v4669_v60 = vrot.slane %v3795_v46, %v4146_v54  ;;  %v206_v62 = vcombine.low %v4494_v58, %v4497_v59  ;;  %v3698_v54 = vld [vmem:[%s5185_s1 + $0x604] ss:$16 sps:$4 sm:$0xff]   ;;  %v3762_v46 = vld [vmem:[%s5185_s1 + $0x760] ss:$16 sps:$4 sm:$0xff]  }
  0x90   :  { %1886 = vmatprep.subr.bf16.mxu0 %v3618_v63  ;;  %2058 = vmatprep.subr.bf16.mxu1 %v3621_v1  ;;  %v3682_v63 = vld [vmem:[%s5185_s1 + $0x5e0] ss:$16 sps:$4 sm:$0xff]  }
  0x91   :  { %v209_v58 = vcombine.high %v4666_v55, %v4669_v60  ;;  %v230_v59 = vpack.c.bf16 %v206_v62, %v134_v61  ;;  %v3696_v1 = vld [vmem:[%s5185_s1 + $0x600] ss:$16 sps:$4 sm:$0xff]   ;;  %v3771_v61 = vld [vmem:[%s5185_s1 + $0x788] ss:$16 sps:$4 sm:$0xff]   ;;  %v3776_v62 = vld [vmem:[%s5185_s1 + $0x7a4] ss:$16 sps:$4 sm:$0xff]  }
  0x93   :  { %1887 = vmatpush1.bf16.msra.mxu0 %v3616_v3  ;;  %2059 = vmatpush1.bf16.msra.mxu1 %v3619_v4  ;;  %v3704_v3 = vld [vmem:[%s5185_s1 + $0x624] ss:$16 sps:$4 sm:$0xff]   ;;  %v3707_v4 = vld [vmem:[%s5185_s1 + $0x62c] ss:$16 sps:$4 sm:$0xff]  }
  0x94   :  { %1888 = vmatprep.subr.bf16.mxu0 %v3624_v5  ;;  %2060 = vmatprep.subr.bf16.mxu1 %v3627_v6  ;;  %v233_v5 = vpack.c.bf16 %v209_v58, %v137_v57  ;;  %v3702_v6 = vld [vmem:[%s5185_s1 + $0x620] ss:$16 sps:$4 sm:$0xff]   ;;  %v3785_v57 = vld [vmem:[%s5185_s1 + $0x7cc] ss:$16 sps:$4 sm:$0xff]  }
  0x95   :  { %v3780_v58 = vld [vmem:[%s5185_s1 + $0x7c0] ss:$16 sps:$4 sm:$0xff]  }
  0x97   :  { %1889 = vmatpush1.bf16.msra.mxu0 %v3622_v7  ;;  %2061 = vmatpush1.bf16.msra.mxu1 %v3625_v8  ;;  %v3705_v7 = vld [vmem:[%s5185_s1 + $0x628] ss:$16 sps:$4 sm:$0xff]   ;;  %v3710_v8 = vld [vmem:[%s5185_s1 + $0x644] ss:$16 sps:$4 sm:$0xff]  }
  0x98   :  { %1890 = vmatprep.subr.bf16.mxu0 %v3630_v9  ;;  %2062 = vmatprep.subr.bf16.mxu1 %v3633_v10  ;;  %v3708_v9 = vld [vmem:[%s5185_s1 + $0x640] ss:$16 sps:$4 sm:$0xff]   ;;  %v3713_v10 = vld [vmem:[%s5185_s1 + $0x64c] ss:$16 sps:$4 sm:$0xff]  }
  0x9b   :  { %1891 = vmatpush1.bf16.msra.mxu0 %v3628_v11  ;;  %2063 = vmatpush1.bf16.msra.mxu1 %v3631_v12  ;;  %v3711_v11 = vld [vmem:[%s5185_s1 + $0x648] ss:$16 sps:$4 sm:$0xff]   ;;  %v3716_v12 = vld [vmem:[%s5185_s1 + $0x664] ss:$16 sps:$4 sm:$0xff]  }
  0x9c   :  { %1892 = vmatprep.subr.bf16.mxu0 %v3636_v13  ;;  %2064 = vmatprep.subr.bf16.mxu1 %v3639_v14  ;;  %v3719_v13 = vld [vmem:[%s5185_s1 + $0x66c] ss:$16 sps:$4 sm:$0xff]   ;;  %v3714_v14 = vld [vmem:[%s5185_s1 + $0x660] ss:$16 sps:$4 sm:$0xff]  }
  0x9f   :  { %1893 = vmatpush1.bf16.msra.mxu0 %v3634_v15  ;;  %2065 = vmatpush1.bf16.msra.mxu1 %v3637_v16  ;;  %v3717_v15 = vld [vmem:[%s5185_s1 + $0x668] ss:$16 sps:$4 sm:$0xff]   ;;  %v3722_v16 = vld [vmem:[%s5185_s1 + $0x684] ss:$16 sps:$4 sm:$0xff]  }
  0xa0   :  { %1894 = vmatprep.subr.bf16.mxu0 %v3642_v17  ;;  %2066 = vmatprep.subr.bf16.mxu1 %v3645_v18  ;;  %v3725_v17 = vld [vmem:[%s5185_s1 + $0x68c] ss:$16 sps:$4 sm:$0xff]   ;;  %v3720_v18 = vld [vmem:[%s5185_s1 + $0x680] ss:$16 sps:$4 sm:$0xff]  }
  0xa3   :  { %1895 = vmatpush1.bf16.msra.mxu0 %v3640_v23  ;;  %2067 = vmatpush1.bf16.msra.mxu1 %v3643_v24  ;;  %v3723_v23 = vld [vmem:[%s5185_s1 + $0x688] ss:$16 sps:$4 sm:$0xff]   ;;  %v3728_v24 = vld [vmem:[%s5185_s1 + $0x6a4] ss:$16 sps:$4 sm:$0xff]  }
  0xa4   :  { %1896 = vmatprep.subr.bf16.mxu0 %v3648_v25  ;;  %2068 = vmatprep.subr.bf16.mxu1 %v3651_v26  ;;  %v3731_v25 = vld [vmem:[%s5185_s1 + $0x6ac] ss:$16 sps:$4 sm:$0xff]   ;;  %v3726_v26 = vld [vmem:[%s5185_s1 + $0x6a0] ss:$16 sps:$4 sm:$0xff]  }
  0xa7   :  { %1897 = vmatpush1.bf16.msra.mxu0 %v3646_v27  ;;  %2069 = vmatpush1.bf16.msra.mxu1 %v3649_v28  ;;  %v3729_v27 = vld [vmem:[%s5185_s1 + $0x6a8] ss:$16 sps:$4 sm:$0xff]   ;;  %v3734_v28 = vld [vmem:[%s5185_s1 + $0x6c4] ss:$16 sps:$4 sm:$0xff]  }
  0xa8   :  { %1898 = vmatprep.subr.bf16.mxu0 %v3654_v29  ;;  %2070 = vmatprep.subr.bf16.mxu1 %v3657_v30  ;;  %v3737_v29 = vld [vmem:[%s5185_s1 + $0x6cc] ss:$16 sps:$4 sm:$0xff]   ;;  %v3732_v30 = vld [vmem:[%s5185_s1 + $0x6c0] ss:$16 sps:$4 sm:$0xff]  }
  0xab   :  { %1899 = vmatpush1.bf16.msra.mxu0 %v3652_v31  ;;  %2071 = vmatpush1.bf16.msra.mxu1 %v3655_v32  ;;  %v3735_v31 = vld [vmem:[%s5185_s1 + $0x6c8] ss:$16 sps:$4 sm:$0xff]   ;;  %v3740_v32 = vld [vmem:[%s5185_s1 + $0x6e4] ss:$16 sps:$4 sm:$0xff]  }
  0xac   :  { %1900 = vmatprep.subr.bf16.mxu0 %v3660_v33  ;;  %2072 = vmatprep.subr.bf16.mxu1 %v3663_v34  ;;  %v3743_v33 = vld [vmem:[%s5185_s1 + $0x6ec] ss:$16 sps:$4 sm:$0xff]   ;;  %v3738_v34 = vld [vmem:[%s5185_s1 + $0x6e0] ss:$16 sps:$4 sm:$0xff]  }
  0xaf   :  { %1901 = vmatpush1.bf16.msra.mxu0 %v3658_v35  ;;  %2073 = vmatpush1.bf16.msra.mxu1 %v3661_v36  ;;  %v3741_v35 = vld [vmem:[%s5185_s1 + $0x6e8] ss:$16 sps:$4 sm:$0xff]   ;;  %v3746_v36 = vld [vmem:[%s5185_s1 + $0x704] ss:$16 sps:$4 sm:$0xff]  }
  0xb0   :  { %1902 = vmatprep.subr.bf16.mxu0 %v3666_v37  ;;  %2074 = vmatprep.subr.bf16.mxu1 %v3669_v38  ;;  %v3749_v37 = vld [vmem:[%s5185_s1 + $0x70c] ss:$16 sps:$4 sm:$0xff]   ;;  %v3744_v38 = vld [vmem:[%s5185_s1 + $0x700] ss:$16 sps:$4 sm:$0xff]  }
  0xb3   :  { %1903 = vmatpush1.bf16.msra.mxu0 %v3664_v39  ;;  %2075 = vmatpush1.bf16.msra.mxu1 %v3667_v19  ;;  %v3747_v39 = vld [vmem:[%s5185_s1 + $0x708] ss:$16 sps:$4 sm:$0xff]   ;;  %v3752_v19 = vld [vmem:[%s5185_s1 + $0x724] ss:$16 sps:$4 sm:$0xff]  }
  0xb4   :  { %1904 = vmatprep.subr.bf16.mxu0 %v3672_v20  ;;  %2076 = vmatprep.subr.bf16.mxu1 %v3675_v21  ;;  %v3755_v20 = vld [vmem:[%s5185_s1 + $0x72c] ss:$16 sps:$4 sm:$0xff]   ;;  %v3750_v21 = vld [vmem:[%s5185_s1 + $0x720] ss:$16 sps:$4 sm:$0xff]  }
  0xb7   :  { %1905 = vmatpush1.bf16.msra.mxu0 %v3670_v22  ;;  %2077 = vmatpush1.bf16.msra.mxu1 %v3673_v40  ;;  %v3753_v22 = vld [vmem:[%s5185_s1 + $0x728] ss:$16 sps:$4 sm:$0xff]   ;;  %v3758_v40 = vld [vmem:[%s5185_s1 + $0x744] ss:$16 sps:$4 sm:$0xff]  }
  0xb8   :  { %1906 = vmatprep.subr.bf16.mxu0 %v3678_v41  ;;  %2078 = vmatprep.subr.bf16.mxu1 %v3681_v42  ;;  %v3761_v41 = vld [vmem:[%s5185_s1 + $0x74c] ss:$16 sps:$4 sm:$0xff]   ;;  %v3756_v42 = vld [vmem:[%s5185_s1 + $0x740] ss:$16 sps:$4 sm:$0xff]  }
  0xbb   :  { %1907 = vmatpush1.bf16.msra.mxu0 %v3676_v48  ;;  %2079 = vmatpush1.bf16.msra.mxu1 %v3679_v49  ;;  %v3765_v48 = vld [vmem:[%s5185_s1 + $0x768] ss:$16 sps:$4 sm:$0xff]   ;;  %v3770_v49 = vld [vmem:[%s5185_s1 + $0x784] ss:$16 sps:$4 sm:$0xff]  }
  0xbc   :  { %1908 = vmatprep.subr.bf16.mxu0 %v3684_v50  ;;  %2080 = vmatprep.subr.bf16.mxu1 %v3687_v51  ;;  %v3773_v50 = vld [vmem:[%s5185_s1 + $0x78c] ss:$16 sps:$4 sm:$0xff]   ;;  %v3768_v51 = vld [vmem:[%s5185_s1 + $0x780] ss:$16 sps:$4 sm:$0xff]  }
  0xbf   :  { %1909 = vmatpush1.bf16.msra.mxu0 %v3682_v63  ;;  %2081 = vmatpush1.bf16.msra.mxu1 %v3685_v0  ;;  %v3779_v63 = vld [vmem:[%s5185_s1 + $0x7ac] ss:$16 sps:$4 sm:$0xff]   ;;  %v3774_v0 = vld [vmem:[%s5185_s1 + $0x7a0] ss:$16 sps:$4 sm:$0xff]  }
  0xc0   :  { %1921 = vmatprep.subr.bf16.mxu0 %v3698_v54  ;;  %2093 = vmatprep.subr.bf16.mxu1 %v3701_v56  ;;  %v3777_v54 = vld [vmem:[%s5185_s1 + $0x7a8] ss:$16 sps:$4 sm:$0xff]   ;;  %v3782_v56 = vld [vmem:[%s5185_s1 + $0x7c4] ss:$16 sps:$4 sm:$0xff]  }
  0xc2   :  { %1911 = vmatmul.mubr.bf16.vlgmr.msra.gmra.mrb[0].mxu0 %v230_v59  ;;  %2083 = vmatmul.mubr.bf16.vlgmr.msra.gmra.mrb[0].mxu1 %v230_v59  ;;  %v3783_v59 = vld [vmem:[%s5185_s1 + $0x7c8] ss:$16 sps:$4 sm:$0xff]  }
  0xc3   :  { %1922 = vmatpush1.bf16.msra.mxu0 %v3696_v1  ;;  %2094 = vmatpush1.bf16.msra.mxu1 %v3699_v2  ;;  %v3788_v1 = vld [vmem:[%s5185_s1 + $0x7e4] ss:$16 sps:$4 sm:$0xff]   ;;  %v3791_v2 = vld [vmem:[%s5185_s1 + $0x7ec] ss:$16 sps:$4 sm:$0xff]  }
  0xc4   :  { %1923 = vmatprep.subr.bf16.mxu0 %v3704_v3  ;;  %2095 = vmatprep.subr.bf16.mxu1 %v3707_v4  ;;  %v136_v3 = vcombine.low %v4660_v52, %v4663_v53  ;;  %v208_v4 = vcombine.low %v4666_v55, %v4669_v60  ;;  %v3796_v53 = vld [vmem:[%s5187_s3] ss:$8 sps:$4 sm:$0xff]   ;;  %v3801_v55 = vld [vmem:[%s5187_s3 + $0x14] ss:$8 sps:$4 sm:$0xff]   ;;  %v3799_v60 = vld [vmem:[%s5187_s3 + $0x10] ss:$8 sps:$4 sm:$0xff]  }
  0xc5   :  { %1953 = vmatprep.mubr.bf16.mxu0 %v233_v5  ;;  %2125 = vmatprep.mubr.bf16.mxu1 %v233_v5  ;;  %v3786_v5 = vld [vmem:[%s5185_s1 + $0x7e0] ss:$16 sps:$4 sm:$0xff]  }
  0xc6   :  { %v232_v52 = vpack.c.bf16 %v208_v4, %v136_v3 }
  0xc7   :  { %1924 = vmatpush1.bf16.msra.mxu0 %v3702_v6  ;;  %2096 = vmatpush1.bf16.msra.mxu1 %v3705_v7  ;;  %v3789_v6 = vld [vmem:[%s5185_s1 + $0x7e8] ss:$16 sps:$4 sm:$0xff]   ;;  %v3798_v7 = vld [vmem:[%s5187_s3 + $0x4] ss:$8 sps:$4 sm:$0xff]  }
  0xc8   :  { %1925 = vmatprep.subr.bf16.mxu0 %v3710_v8  ;;  %2097 = vmatprep.subr.bf16.mxu1 %v3713_v10  ;;  %v3804_v8 = vld [vmem:[%s5187_s3 + $0x24] ss:$8 sps:$4 sm:$0xff]   ;;  %v3807_v10 = vld [vmem:[%s5187_s3 + $0x34] ss:$8 sps:$4 sm:$0xff]  }
  0xcb   :  { %1926 = vmatpush1.bf16.msra.mxu0 %v3708_v9  ;;  %2098 = vmatpush1.bf16.msra.mxu1 %v3711_v11  ;;  %v3802_v9 = vld [vmem:[%s5187_s3 + $0x20] ss:$8 sps:$4 sm:$0xff]   ;;  %v3805_v11 = vld [vmem:[%s5187_s3 + $0x30] ss:$8 sps:$4 sm:$0xff]  }
  0xcc   :  { %1927 = vmatprep.subr.bf16.mxu0 %v3716_v12  ;;  %2099 = vmatprep.subr.bf16.mxu1 %v3719_v13  ;;  %v3810_v12 = vld [vmem:[%s5187_s3 + $0x44] ss:$8 sps:$4 sm:$0xff]   ;;  %v3808_v13 = vld [vmem:[%s5187_s3 + $0x40] ss:$8 sps:$4 sm:$0xff]  }
  0xcf   :  { %1928 = vmatpush1.bf16.msra.mxu0 %v3714_v14  ;;  %2100 = vmatpush1.bf16.msra.mxu1 %v3717_v15  ;;  %v3813_v14 = vld [vmem:[%s5187_s3 + $0x54] ss:$8 sps:$4 sm:$0xff]   ;;  %v3811_v15 = vld [vmem:[%s5187_s3 + $0x50] ss:$8 sps:$4 sm:$0xff]  }
  0xd0   :  { %1929 = vmatprep.subr.bf16.mxu0 %v3722_v16  ;;  %2101 = vmatprep.subr.bf16.mxu1 %v3725_v17  ;;  %v3816_v16 = vld [vmem:[%s5187_s3 + $0x64] ss:$8 sps:$4 sm:$0xff]   ;;  %v3814_v17 = vld [vmem:[%s5187_s3 + $0x60] ss:$8 sps:$4 sm:$0xff]  }
  0xd3   :  { %1930 = vmatpush1.bf16.msra.mxu0 %v3720_v18  ;;  %2102 = vmatpush1.bf16.msra.mxu1 %v3723_v23  ;;  %v3819_v18 = vld [vmem:[%s5187_s3 + $0x74] ss:$8 sps:$4 sm:$0xff]   ;;  %v3817_v23 = vld [vmem:[%s5187_s3 + $0x70] ss:$8 sps:$4 sm:$0xff]  }
  0xd4   :  { %1931 = vmatprep.subr.bf16.mxu0 %v3728_v24  ;;  %2103 = vmatprep.subr.bf16.mxu1 %v3731_v25  ;;  %v3822_v24 = vld [vmem:[%s5187_s3 + $0x84] ss:$8 sps:$4 sm:$0xff]   ;;  %v3820_v25 = vld [vmem:[%s5187_s3 + $0x80] ss:$8 sps:$4 sm:$0xff]  }
  0xd7   :  { %1932 = vmatpush1.bf16.msra.mxu0 %v3726_v26  ;;  %2104 = vmatpush1.bf16.msra.mxu1 %v3729_v27  ;;  %v3825_v26 = vld [vmem:[%s5187_s3 + $0x94] ss:$8 sps:$4 sm:$0xff]   ;;  %v3823_v27 = vld [vmem:[%s5187_s3 + $0x90] ss:$8 sps:$4 sm:$0xff]  }
  0xd8   :  { %1933 = vmatprep.subr.bf16.mxu0 %v3734_v28  ;;  %2105 = vmatprep.subr.bf16.mxu1 %v3737_v29  ;;  %v3828_v28 = vld [vmem:[%s5187_s3 + $0xa4] ss:$8 sps:$4 sm:$0xff]   ;;  %v3826_v29 = vld [vmem:[%s5187_s3 + $0xa0] ss:$8 sps:$4 sm:$0xff]  }
  0xdb   :  { %1934 = vmatpush1.bf16.msra.mxu0 %v3732_v30  ;;  %2106 = vmatpush1.bf16.msra.mxu1 %v3735_v31  ;;  %v3831_v30 = vld [vmem:[%s5187_s3 + $0xb4] ss:$8 sps:$4 sm:$0xff]   ;;  %v3829_v31 = vld [vmem:[%s5187_s3 + $0xb0] ss:$8 sps:$4 sm:$0xff]  }
  0xdc   :  { %1935 = vmatprep.subr.bf16.mxu0 %v3740_v32  ;;  %2107 = vmatprep.subr.bf16.mxu1 %v3743_v33  ;;  %v3834_v32 = vld [vmem:[%s5187_s3 + $0xc4] ss:$8 sps:$4 sm:$0xff]   ;;  %v3832_v33 = vld [vmem:[%s5187_s3 + $0xc0] ss:$8 sps:$4 sm:$0xff]  }
  0xdf   :  { %1936 = vmatpush1.bf16.msra.mxu0 %v3738_v34  ;;  %2108 = vmatpush1.bf16.msra.mxu1 %v3741_v35  ;;  %v3837_v34 = vld [vmem:[%s5187_s3 + $0xd4] ss:$8 sps:$4 sm:$0xff]   ;;  %v3835_v35 = vld [vmem:[%s5187_s3 + $0xd0] ss:$8 sps:$4 sm:$0xff]  }
  0xe0   :  { %1937 = vmatprep.subr.bf16.mxu0 %v3746_v36  ;;  %2109 = vmatprep.subr.bf16.mxu1 %v3749_v37  ;;  %v3840_v36 = vld [vmem:[%s5187_s3 + $0xe4] ss:$8 sps:$4 sm:$0xff]   ;;  %v3838_v37 = vld [vmem:[%s5187_s3 + $0xe0] ss:$8 sps:$4 sm:$0xff]  }
  0xe3   :  { %1938 = vmatpush1.bf16.msra.mxu0 %v3744_v38  ;;  %2110 = vmatpush1.bf16.msra.mxu1 %v3747_v39  ;;  %v3843_v38 = vld [vmem:[%s5187_s3 + $0xf4] ss:$8 sps:$4 sm:$0xff]   ;;  %v3841_v39 = vld [vmem:[%s5187_s3 + $0xf0] ss:$8 sps:$4 sm:$0xff]  }
  0xe4   :  { %1939 = vmatprep.subr.bf16.mxu0 %v3752_v19  ;;  %2111 = vmatprep.subr.bf16.mxu1 %v3755_v20  ;;  %v3846_v19 = vld [vmem:[%s5187_s3 + $0x104] ss:$8 sps:$4 sm:$0xff]  }
  0xe5   :  { %v3892_v20 = vld [vmem:[%s5189_s5 + $0x40] sm:$0xff]  }
  0xe7   :  { %1940 = vmatpush1.bf16.msra.mxu0 %v3750_v21  ;;  %2112 = vmatpush1.bf16.msra.mxu1 %v3753_v22  ;;  %v3893_v21 = vld [vmem:[%s5189_s5] sm:$0xff]   ;;  %v3894_v22 = vld [vmem:[%s5189_s5 + $0x48] sm:$0xff]  }
  0xe8   :  { %1941 = vmatprep.subr.bf16.mxu0 %v3758_v40  ;;  %2113 = vmatprep.subr.bf16.mxu1 %v3761_v41  ;;  %v3895_v40 = vld [vmem:[%s5189_s5 + $0x8] sm:$0xff]   ;;  %v3896_v41 = vld [vmem:[%s5189_s5 + $0x50] sm:$0xff]  }
  0xeb   :  { %1942 = vmatpush1.bf16.msra.mxu0 %v3756_v42  ;;  %2114 = vmatpush1.bf16.msra.mxu1 %v3759_v43  ;;  %v3897_v42 = vld [vmem:[%s5189_s5 + $0x10] sm:$0xff]   ;;  %v3898_v43 = vld [vmem:[%s5189_s5 + $0x58] sm:$0xff]  }
  0xec   :  { %1943 = vmatprep.subr.bf16.mxu0 %v3764_v44  ;;  %2115 = vmatprep.subr.bf16.mxu1 %v3767_v45  ;;  %v3899_v44 = vld [vmem:[%s5189_s5 + $0x18] sm:$0xff]   ;;  %v3900_v45 = vld [vmem:[%s5189_s5 + $0x60] sm:$0xff]  }
  0xef   :  { %1944 = vmatpush1.bf16.msra.mxu0 %v3762_v46  ;;  %2116 = vmatpush1.bf16.msra.mxu1 %v3765_v48  ;;  %v3901_v46 = vld [vmem:[%s5189_s5 + $0x20] sm:$0xff]   ;;  %v3902_v48 = vld [vmem:[%s5189_s5 + $0x68] sm:$0xff]  }
  0xf0   :  { %1945 = vmatprep.subr.bf16.mxu0 %v3770_v49  ;;  %2117 = vmatprep.subr.bf16.mxu1 %v3773_v50  ;;  %v494_v49 = vsub.s32 0, %v4125_v47  ;;  %v490_v50 = vld [vmem:[%s5186_s2] sm:$0xf] }
  0xf3   :  { %1946 = vmatpush1.bf16.msra.mxu0 %v3768_v51  ;;  %2118 = vmatpush1.bf16.msra.mxu1 %v3771_v61  ;;  %v502_v51 = vsub.s32 2, %v4125_v47  ;;  %v498_v61 = vsub.s32 1, %v4125_v47 }
  0xf4   :  { %1947 = vmatprep.subr.bf16.mxu0 %v3776_v62  ;;  %2119 = vmatprep.subr.bf16.mxu1 %v3779_v63  ;;  %v506_v62 = vsub.s32 3, %v4125_v47  ;;  %v495_v63 = vrot.slane %v490_v50, %v494_v49  ;;  %v3909_v47 = vld [vmem:[%s5191_s7 + $0x8] sm:$0xff]  }
  0xf7   :  { %1948 = vmatpush1.bf16.msra.mxu0 %v3774_v0  ;;  %2120 = vmatpush1.bf16.msra.mxu1 %v3777_v54  ;;  %v503_v0 = vrot.slane %v490_v50, %v502_v51  ;;  %v499_v54 = vrot.slane %v490_v50, %v498_v61  ;;  %v3888_v51 = vld [vmem:[%s5187_s3 + $0x1e4] ss:$8 sps:$4 sm:$0xff]  }
  0xf8   :  { %1949 = vmatprep.subr.bf16.mxu0 %v3782_v56  ;;  %2121 = vmatprep.subr.bf16.mxu1 %v3785_v57  ;;  %v507_v56 = vrot.slane %v490_v50, %v506_v62  ;;  %v3883_v50 = vld [vmem:[%s5187_s3 + $0x1d0] ss:$8 sps:$4 sm:$0xff]   ;;  %v3886_v62 = vld [vmem:[%s5187_s3 + $0x1e0] ss:$8 sps:$4 sm:$0xff]  }
  0xfb   :  { %1950 = vmatpush1.bf16.msra.mxu0 %v3780_v58  ;;  %2122 = vmatpush1.bf16.msra.mxu1 %v3783_v59 }
  0xfc   :  { %1951 = vmatprep.subr.bf16.mxu0 %v3788_v1  ;;  %2123 = vmatprep.subr.bf16.mxu1 %v3791_v2 }
  0xff   :  { %1952 = vmatpush1.bf16.msra.mxu0 %v3786_v5  ;;  %2124 = vmatpush1.bf16.msra.mxu1 %v3789_v6 }
 0x100   :  { %2544 = vmatprep.subr.bf16.mxu0 %v3798_v7  ;;  %3291 = vmatprep.subr.bf16.mxu1 %v3892_v20  ;;  %v3870_v20 = vld [vmem:[%s5187_s3 + $0x184] ss:$8 sps:$4 sm:$0xff]  }
 0x102   :  { %1954 = vmatmul.mubr.bf16.vlgmr.msra.gmra.mrb[0].mxu0 %v232_v52  ;;  %2126 = vmatmul.mubr.bf16.vlgmr.msra.gmra.mrb[0].mxu1 %v232_v52 }
 0x103   :  { %2545 = vmatpush1.bf16.msra.mxu0 %v3796_v53  ;;  %3292 = vmatpush3.bf16.msra.mxu1 %v3893_v21  ;;  %v3868_v21 = vld [vmem:[%s5187_s3 + $0x180] ss:$8 sps:$4 sm:$0xff]  }
 0x104   :  { %2546 = vmatprep.subr.bf16.mxu0 %v3801_v55  ;;  %3293 = vmatprep.subr.bf16.mxu1 %v3894_v22  ;;  %v3873_v22 = vld [vmem:[%s5187_s3 + $0x194] ss:$8 sps:$4 sm:$0xff]  }
 0x107   :  { %2547 = vmatpush1.bf16.msra.mxu0 %v3799_v60  ;;  %3294 = vmatpush3.bf16.msra.mxu1 %v3895_v40  ;;  %v3871_v40 = vld [vmem:[%s5187_s3 + $0x190] ss:$8 sps:$4 sm:$0xff]  }
 0x108   :  { %2548 = vmatprep.subr.bf16.mxu0 %v3804_v8  ;;  %3295 = vmatprep.subr.bf16.mxu1 %v3896_v41  ;;  %v3876_v41 = vld [vmem:[%s5187_s3 + $0x1a4] ss:$8 sps:$4 sm:$0xff]  }
 0x10b   :  { %2549 = vmatpush1.bf16.msra.mxu0 %v3802_v9  ;;  %3296 = vmatpush3.bf16.msra.mxu1 %v3897_v42  ;;  %v3874_v42 = vld [vmem:[%s5187_s3 + $0x1a0] ss:$8 sps:$4 sm:$0xff]  }
 0x10c   :  { %2550 = vmatprep.subr.bf16.mxu0 %v3807_v10  ;;  %3297 = vmatprep.subr.bf16.mxu1 %v3898_v43  ;;  %v3879_v43 = vld [vmem:[%s5187_s3 + $0x1b4] ss:$8 sps:$4 sm:$0xff]  }
 0x10f   :  { %2551 = vmatpush1.bf16.msra.mxu0 %v3805_v11  ;;  %3298 = vmatpush3.bf16.msra.mxu1 %v3899_v44  ;;  %v3877_v44 = vld [vmem:[%s5187_s3 + $0x1b0] ss:$8 sps:$4 sm:$0xff]  }
 0x110   :  { %2552 = vmatprep.subr.bf16.mxu0 %v3810_v12  ;;  %3299 = vmatprep.subr.bf16.mxu1 %v3900_v45  ;;  %v3882_v45 = vld [vmem:[%s5187_s3 + $0x1c4] ss:$8 sps:$4 sm:$0xff]  }
 0x113   :  { %2553 = vmatpush1.bf16.msra.mxu0 %v3808_v13  ;;  %3300 = vmatpush3.bf16.msra.mxu1 %v3901_v46  ;;  %v3880_v46 = vld [vmem:[%s5187_s3 + $0x1c0] ss:$8 sps:$4 sm:$0xff]  }
 0x114   :  { %2554 = vmatprep.subr.bf16.mxu0 %v3813_v14  ;;  %3301 = vmatprep.subr.bf16.mxu1 %v3902_v48  ;;  %v3885_v48 = vld [vmem:[%s5187_s3 + $0x1d4] ss:$8 sps:$4 sm:$0xff]  }
 0x117   :  { %2555 = vmatpush1.bf16.msra.mxu0 %v3811_v15 }
 0x118   :  { %2556 = vmatprep.subr.bf16.mxu0 %v3816_v16 }
 0x11b   :  { %2557 = vmatpush1.bf16.msra.mxu0 %v3814_v17 }
 0x11c   :  { %2558 = vmatprep.subr.bf16.mxu0 %v3819_v18 }
 0x11f   :  { %2559 = vmatpush1.bf16.msra.mxu0 %v3817_v23 }
 0x120   :  { %2560 = vmatprep.subr.bf16.mxu0 %v3822_v24 }
 0x123   :  { %2561 = vmatpush1.bf16.msra.mxu0 %v3820_v25  ;;  %v3844_v25 = vld [vmem:[%s5187_s3 + $0x100] ss:$8 sps:$4 sm:$0xff]  }
 0x124   :  { %2562 = vmatprep.subr.bf16.mxu0 %v3825_v26 }
 0x127   :  { %2563 = vmatpush1.bf16.msra.mxu0 %v3823_v27  ;;  %v3849_v27 = vld [vmem:[%s5187_s3 + $0x114] ss:$8 sps:$4 sm:$0xff]  }
 0x128   :  { %2564 = vmatprep.subr.bf16.mxu0 %v3828_v28  ;;  %v3847_v28 = vld [vmem:[%s5187_s3 + $0x110] ss:$8 sps:$4 sm:$0xff]  }
 0x12b   :  { %2565 = vmatpush1.bf16.msra.mxu0 %v3826_v29  ;;  %v3852_v29 = vld [vmem:[%s5187_s3 + $0x124] ss:$8 sps:$4 sm:$0xff]  }
 0x12c   :  { %2566 = vmatprep.subr.bf16.mxu0 %v3831_v30  ;;  %v3850_v30 = vld [vmem:[%s5187_s3 + $0x120] ss:$8 sps:$4 sm:$0xff]  }
 0x12f   :  { %2567 = vmatpush1.bf16.msra.mxu0 %v3829_v31  ;;  %v3855_v31 = vld [vmem:[%s5187_s3 + $0x134] ss:$8 sps:$4 sm:$0xff]  }
 0x130   :  { %2568 = vmatprep.subr.bf16.mxu0 %v3834_v32  ;;  %v3853_v32 = vld [vmem:[%s5187_s3 + $0x130] ss:$8 sps:$4 sm:$0xff]  }
 0x133   :  { %2569 = vmatpush1.bf16.msra.mxu0 %v3832_v33  ;;  %v3858_v33 = vld [vmem:[%s5187_s3 + $0x144] ss:$8 sps:$4 sm:$0xff]  }
 0x134   :  { %2570 = vmatprep.subr.bf16.mxu0 %v3837_v34  ;;  %v3856_v34 = vld [vmem:[%s5187_s3 + $0x140] ss:$8 sps:$4 sm:$0xff]  }
 0x137   :  { %2571 = vmatpush1.bf16.msra.mxu0 %v3835_v35  ;;  %v3861_v35 = vld [vmem:[%s5187_s3 + $0x154] ss:$8 sps:$4 sm:$0xff]  }
 0x138   :  { %2572 = vmatprep.subr.bf16.mxu0 %v3840_v36  ;;  %v3859_v36 = vld [vmem:[%s5187_s3 + $0x150] ss:$8 sps:$4 sm:$0xff]  }
 0x13b   :  { %2573 = vmatpush1.bf16.msra.mxu0 %v3838_v37  ;;  %v3864_v37 = vld [vmem:[%s5187_s3 + $0x164] ss:$8 sps:$4 sm:$0xff]  }
 0x13c   :  { %2574 = vmatprep.subr.bf16.mxu0 %v3843_v38  ;;  %v3862_v38 = vld [vmem:[%s5187_s3 + $0x160] ss:$8 sps:$4 sm:$0xff]  }
 0x13f   :  { %2575 = vmatpush1.bf16.msra.mxu0 %v3841_v39  ;;  %v3867_v39 = vld [vmem:[%s5187_s3 + $0x174] ss:$8 sps:$4 sm:$0xff]  }
 0x140   :  { %2587 = vmatprep.subr.bf16.mxu0 %v3846_v19  ;;  %v3865_v19 = vld [vmem:[%s5187_s3 + $0x170] ss:$8 sps:$4 sm:$0xff]  }
 0x1d5   :  { %v1955_v57 = vpop.f32.mrb[0].mxu0  ;;  %v2127_v59 = vpop.f32.mrb[0].mxu1 }
 0x1d6   :  { %v3342_v58 = vadd.f32 %v1955_v57, %v495_v63  ;;  %v1957_v1 = vpop.f32.mrb[1].mxu0  ;;  %v3346_v2 = vadd.f32 %v2127_v59, %v503_v0  ;;  %v2129_v4 = vpop.f32.mrb[1].mxu1  ;;  %v3905_v57 = vld [vmem:[%s5189_s5 + $0x30] sm:$0xff]   ;;  %v3907_v59 = vld [vmem:[%s5189_s5 + $0x38] sm:$0xff]  }
 0x1d7   :  { %v3343_v3 = vadd.f32 %v1957_v1, %v499_v54  ;;  %v1959_v5 = vpop.f32.mrb[2].mxu0  ;;  %v3347_v6 = vadd.f32 %v2129_v4, %v507_v56  ;;  %v2131_v52 = vpop.f32.mrb[2].mxu1  ;;  %v3941_v1 = vmov 0.0  }
 0x1d8   :  { %v3344_v7 = vadd.f32 %v1959_v5, %v495_v63  ;;  %v1961_v53 = vpop.f32.mrb[3].mxu0  ;;  %v3348_v55 = vadd.f32 %v2131_v52, %v503_v0  ;;  %v2133_v8 = vpop.f32.mrb[3].mxu1  ;;  %v2136_v9 = vmax.f32 %v3342_v58, 0.0  ;;  %v2138_v12 = vmax.f32 %v3346_v2, 0.0  ;;  %v3891_v63 = vld [vmem:[%s5187_s3 + $0x1f4] ss:$8 sps:$4 sm:$0xff]  }
 0x1d9   :  { %v3345_v60 = vadd.f32 %v1961_v53, %v499_v54  ;;  %v3349_v11 = vadd.f32 %v2133_v8, %v507_v56  ;;  %v2137_v13 = vmax.f32 %v3343_v3, 0.0  ;;  %v2139_v16 = vmax.f32 %v3347_v6, 0.0  ;;  %v3889_v0 = vld [vmem:[%s5187_s3 + $0x1f0] ss:$8 sps:$4 sm:$0xff]   ;;  %v3903_v54 = vld [vmem:[%s5189_s5 + $0x28] sm:$0xff]  }
 0x1da   :  { %v2140_v10 = vmax.f32 %v3344_v7, 0.0  ;;  %v2142_v14 = vmax.f32 %v3348_v55, 0.0  ;;  %3302 = vmatpush3.bf16.msra.mxu1 %v3903_v54  ;;  %v3904_v56 = vld [vmem:[%s5189_s5 + $0x70] sm:$0xff]   ;;  %v3906_v58 = vld [vmem:[%s5189_s5 + $0x78] sm:$0xff]   ;;  %v2212_v2 = vld [vmem:[%s5188_s4] sm:$0x3] }
 0x1db   :  { %v2141_v15 = vmax.f32 %v3345_v60, 0.0  ;;  %v2143_v18 = vmax.f32 %v3349_v11, 0.0  ;;  %3303 = vmatprep.subr.bf16.mxu1 %v3904_v56  ;;  %v2217_v3 = vrot.slane %v2212_v2, %v494_v49  ;;  %v2221_v4 = vrot.slane %v2212_v2, %v498_v61  ;;  %v3908_v49 = vld [vmem:[%s5191_s7] sm:$0xff]   ;;  %v3910_v61 = vld [vmem:[%s5191_s7 + $0x10] sm:$0xff]  }
 0x1dc   :  { %v2144_v17 = vpack.c.bf16 %v2140_v10, %v2136_v9  ;;  %v5024_v23 = vpack.c.bf16 %v2142_v14, %v2138_v12 }
 0x1dd   :  { %v2145_v24 = vpack.c.bf16 %v2141_v15, %v2137_v13  ;;  %v2147_v26 = vpack.c.bf16 %v2143_v18, %v2139_v16  ;;  %v3911_v15 = vld [vmem:[%s5191_s7 + $0x18] sm:$0xff]   ;;  %v3912_v16 = vld [vmem:[%s5191_s7 + $0x20] sm:$0xff]   ;;  %v3914_v18 = vld [vmem:[%s5191_s7 + $0x30] sm:$0xff]  }
 0x1de   :  { %3304 = vmatpush3.bf16.msra.mxu1 %v3905_v57 }
 0x1df   :  { %2576 = vmatprep.mubr.bf16.mxu0 %v2145_v24  ;;  %3305 = vmatprep.subr.bf16.mxu1 %v3906_v58 }
 0x1e0   :  { %2577 = vmatmul.mubr.bf16.vlgmr.msra.gmra.mrb[4].mxu0 %v2144_v17  ;;  %v3913_v17 = vld [vmem:[%s5191_s7 + $0x28] sm:$0xff]  }
 0x1e1   :  { %2588 = vmatpush1.bf16.msra.mxu0 %v3844_v25  ;;  %2619 = vmatprep.mubr.bf16.mxu0 %v2147_v26  ;;  %v3265_v25 = vld [vmem:[%s5190_s6] ss:$0 sm:$0xff] }
 0x1e2   :  { %2589 = vmatprep.subr.bf16.mxu0 %v3849_v27  ;;  %3306 = vmatpush3.bf16.msra.mxu1 %v3907_v59 }
 0x1e3   :  { %3322 = vmatprep.subr.bf16.mxu1 %v3941_v1 }
 0x1e5   :  { %2590 = vmatpush1.bf16.msra.mxu0 %v3847_v28 }
 0x1e6   :  { %2591 = vmatprep.subr.bf16.mxu0 %v3852_v29 }
 0x1e9   :  { %2592 = vmatpush1.bf16.msra.mxu0 %v3850_v30 }
 0x1ea   :  { %2593 = vmatprep.subr.bf16.mxu0 %v3855_v31 }
 0x1ed   :  { %2594 = vmatpush1.bf16.msra.mxu0 %v3853_v32 }
 0x1ee   :  { %2595 = vmatprep.subr.bf16.mxu0 %v3858_v33 }
 0x1f1   :  { %2596 = vmatpush1.bf16.msra.mxu0 %v3856_v34 }
 0x1f2   :  { %2597 = vmatprep.subr.bf16.mxu0 %v3861_v35 }
 0x1f5   :  { %2598 = vmatpush1.bf16.msra.mxu0 %v3859_v36  ;;  %v3282_v36 = vld [vmem:[%s5192_s8] ss:$0 sm:$0xff] }
 0x1f6   :  { %2599 = vmatprep.subr.bf16.mxu0 %v3864_v37 }
 0x1f9   :  { %2600 = vmatpush1.bf16.msra.mxu0 %v3862_v38 }
 0x1fa   :  { %2601 = vmatprep.subr.bf16.mxu0 %v3867_v39 }
 0x1fd   :  { %2602 = vmatpush1.bf16.msra.mxu0 %v3865_v19 }
 0x1fe   :  { %2603 = vmatprep.subr.bf16.mxu0 %v3870_v20 }
 0x201   :  { %2604 = vmatpush1.bf16.msra.mxu0 %v3868_v21 }
 0x202   :  { %2605 = vmatprep.subr.bf16.mxu0 %v3873_v22 }
 0x205   :  { %2606 = vmatpush1.bf16.msra.mxu0 %v3871_v40 }
 0x206   :  { %2607 = vmatprep.subr.bf16.mxu0 %v3876_v41 }
 0x209   :  { %2608 = vmatpush1.bf16.msra.mxu0 %v3874_v42 }
 0x20a   :  { %2609 = vmatprep.subr.bf16.mxu0 %v3879_v43 }
 0x20d   :  { %2610 = vmatpush1.bf16.msra.mxu0 %v3877_v44 }
 0x20e   :  { %2611 = vmatprep.subr.bf16.mxu0 %v3882_v45 }
 0x211   :  { %2612 = vmatpush1.bf16.msra.mxu0 %v3880_v46 }
 0x212   :  { %2613 = vmatprep.subr.bf16.mxu0 %v3885_v48 }
 0x215   :  { %2614 = vmatpush1.bf16.msra.mxu0 %v3883_v50 }
 0x216   :  { %2615 = vmatprep.subr.bf16.mxu0 %v3888_v51 }
 0x219   :  { %2616 = vmatpush1.bf16.msra.mxu0 %v3886_v62 }
 0x21a   :  { %2617 = vmatprep.subr.bf16.mxu0 %v3891_v63 }
 0x21d   :  { %2618 = vmatpush1.bf16.msra.mxu0 %v3889_v0 }
 0x220   :  { %2620 = vmatmul.mubr.bf16.vlgmr.msra.gmra.mrb[4].mxu0 %v5024_v23  ;;  %v3915_v23 = vld [vmem:[%s5191_s7 + $0x38] sm:$0xff]  }
 0x2f3   :  { %v2621_v5 = vpop.f32.mrb[4].mxu0 }
 0x2f4   :  { %v3350_v6 = vadd.f32 %v2621_v5, %v2217_v3  ;;  %v2623_v7 = vpop.f32.mrb[5].mxu0 }
 0x2f5   :  { %v3351_v52 = vadd.f32 %v2623_v7, %v2221_v4  ;;  %v2625_v53 = vpop.f32.mrb[6].mxu0 }
 0x2f6   :  { %v3352_v55 = vadd.f32 %v2625_v53, %v2217_v3  ;;  %v2627_v60 = vpop.f32.mrb[7].mxu0  ;;  %v2630_v9 = vmax.f32 %v3350_v6, 0.0 }
 0x2f7   :  { %v3353_v8 = vadd.f32 %v2627_v60, %v2221_v4  ;;  %v2631_v11 = vmax.f32 %v3351_v52, 0.0 }
 0x2f8   :  { %v2632_v10 = vmax.f32 %v3352_v55, 0.0 }
 0x2f9   :  { %v2633_v12 = vmax.f32 %v3353_v8, 0.0 }
 0x2fa   :  { %v2634_v13 = vpack.c.bf16 %v2632_v10, %v2630_v9 }
 0x2fb   :  { %v2635_v14 = vpack.c.bf16 %v2633_v12, %v2631_v11 }
 0x2fd   :  { %2803 = vmatprep.mubr.bf16.mxu1 %v2635_v14 }
 0x2fe   :  { %2804 = vmatmul.mubr.bf16.vlgmr.msra.gmra.mrb[4].mxu1 %v2634_v13 }
 0x2ff   :  { %3323 = vmatpush3.bf16.msra.mxu1 %v3908_v49  ;;  %3338 = vmatprep.mubr.msk.bf16.mxu1 %vm3942_vm0, %v3941_v1 }
 0x300   :  { %3324 = vmatprep.subr.bf16.mxu1 %v3941_v1 }
 0x303   :  { %3325 = vmatpush3.bf16.msra.mxu1 %v3909_v47 }
 0x304   :  { %3326 = vmatprep.subr.bf16.mxu1 %v3941_v1 }
 0x307   :  { %3327 = vmatpush3.bf16.msra.mxu1 %v3910_v61 }
 0x308   :  { %3328 = vmatprep.subr.bf16.mxu1 %v3941_v1 }
 0x30b   :  { %3329 = vmatpush3.bf16.msra.mxu1 %v3911_v15 }
 0x30c   :  { %3330 = vmatprep.subr.bf16.mxu1 %v3941_v1 }
 0x30f   :  { %3331 = vmatpush3.bf16.msra.mxu1 %v3912_v16 }
 0x310   :  { %3332 = vmatprep.subr.bf16.mxu1 %v3941_v1 }
 0x313   :  { %3333 = vmatpush3.bf16.msra.mxu1 %v3913_v17 }
 0x314   :  { %3334 = vmatprep.subr.bf16.mxu1 %v3941_v1 }
 0x317   :  { %3335 = vmatpush3.bf16.msra.mxu1 %v3914_v18 }
 0x318   :  { %3336 = vmatprep.subr.bf16.mxu1 %v3941_v1 }
 0x31b   :  { %3337 = vmatpush3.bf16.msra.mxu1 %v3915_v23 }
 0x3d1   :  { %v3307_v24 = vpop.f32.mrb[4].mxu1 }
 0x3d2   :  { %v3308_v26 = vpop.f32.mrb[5].mxu1 }
 0x3d3   :  { %v3309_v27 = vadd.f32 %v3308_v26, %v3307_v24  ;;  %v3310_v28 = vpop.f32.mrb[6].mxu1 }
 0x3d4   :  { %v3311_v29 = vpop.f32.mrb[7].mxu1 }
 0x3d5   :  { %v2806_v30 = vadd.f32 %v3309_v27, %v3265_v25  ;;  %v3312_v31 = vadd.f32 %v3311_v29, %v3310_v28 }
 0x3d7   :  { %v2809_v32 = vadd.f32 %v3312_v31, %v3265_v25  ;;  %v2812_v33 = vmax.f32 %v2806_v30, 0.0 }
 0x3d9   :  { %v2813_v34 = vmax.f32 %v2809_v32, 0.0 }
 0x3db   :  { %v2814_v35 = vpack.c.bf16 %v2813_v34, %v2812_v33 }
 0x3dd   :  { %3339 = vmatmul.mubr.bf16.vlgmr.msra.gmra.mrb[8].mxu1 %v2814_v35 }
 0x4b0   :  { %v2920_v37 = vpop.f32.mrb[8].mxu1 }
 0x4b1   :  { %v2921_v38 = vadd.f32 %v3282_v36, %v2920_v37  ;;  %v3340_v39 = vpop.f32.mrb[9].mxu1 }
 0x4b2   :  { %v2923_v19 = vpop.f32.mrb[10].mxu1 }
 0x4b3   :  { %2927 = vst [vmem:[#allocation2] sm:$0xff] %v2921_v38  ;;  %v2924_v20 = vadd.f32 %v3282_v36, %v2923_v19  ;;  %v3341_v21 = vpop.f32.mrb[11].mxu1 }
 0x4b5   :  { %2928 = vst [vmem:[#allocation2 + $0x8] sm:$0xff] %v2924_v20 }
 0x4b6   :  { %2933 = vsyncadd [#allocation3], 224  ;;  %s3943_s6 = smov [#allocation2]  }
 0x4b7   :  { %s2934_s14 = sshll.u32 %s3943_s6, 4  ;;  %s2935_s14 = int_to_ptr.vmem [resolvable:$true] %s2934_s14 }
 0x4b8   :  { %s3916_s15 = scalar_lea.vmem %s2935_s14, 32  ;;  %s3920_s3 = scalar_lea.vmem %s2935_s14, 256 }
 0x4b9   :  { %p3917_p0 = scmp.ne.s32.totalorder %s2935_s14, %s3916_s15  ;;  %p3921_p1 = scmp.lt.s32.totalorder %s2935_s14, %s2935_s14 }
 0x4ba   :  { %p3922_p2 = scmp.lt.s32.totalorder %s3920_s3, %s3916_s15 }
 0x4bc   :  { %p3923_p3 = por %p3922_p2, %p3921_p1 }
 0x4be   :  { %p3924_p4 = pnand %p3923_p3, %p3917_p0 }
 0x4c0   :  { %3927 = shalt.err (!%p3924_p4)
}
 0x4c1   :  { %s3928_s17 = scalar_lea.hbm %s5193_s9, 32 }
 0x4c2   :  { %p3929_p5 = scmp.ne.s32.totalorder %s5193_s9, %s3928_s17  ;;  %p3932_p6 = scmp.lt.u32.totalorder %s3928_s17, %s5193_s9 }
 0x4c4   :  { %p3934_p7 = pnand %p3932_p6, %p3929_p5 }
 0x4c6   :  { %3937 = shalt.err (!%p3934_p7)
}
 0x4c7   :  { %s3944_s5 = smov 32   ;;  %s3945_s20 = smov 2  }
 0x4c8   :  { %2940 = dma.vmem_to_hbm [thread:$0]  %s2935_s14, 32, %s5193_s9, [#allocation3], %s3944_s5, %s3944_s5, %s3945_s20  }
 0x4c9   :  { %3938 = dma.done.wait [#allocation3], 256  }
 0x4ca   :  { %3939 = vsyncadd [#allocation3], 4294967040 }
 0x4cb   :  { %2944 = vsyncpa [#allocation3], 1 }

</bundles_post_ra>
